<compile_context>
chip_gen: v7x
topology: tpu7x:2x2x1
jax: 0.10.0
libtpu: 0.0.40
codegen_flags: <defaults>
</compile_context>

<pallas_src>
import functools

import jax
import jax.numpy as jnp
from jax import lax
from jax.experimental import pallas as pl
from jax.experimental.pallas import tpu as pltpu


def _round_up(x, m):
    return ((x + m - 1) // m) * m


def _detect_num_tensorcores():
    """2 on v7x (two TensorCores per chip), else 1 (v5e/v6e single TC)."""
    try:
        kind = jax.devices()[0].device_kind.lower()
    except Exception:
        return 1
    if "v7" in kind or "7x" in kind:
        return 2
    return 1


def _vmem_capacity_bytes():
    try:
        return int(pltpu.get_tpu_info().vmem_capacity_bytes)
    except Exception:
        # Conservative fallback (v7x per-TC VMEM); v5e/v6e have 128 MiB.
        return 64 * 1024 * 1024


# ---------------------------------------------------------------------------
# Fused-gate kernel: H % 128 == 0 -> single (Nb,H)x(H,4H) matmul per step.
# ---------------------------------------------------------------------------
def _lstm_fused_kernel(xg_ref, w_hh_ref, h_last_ref, h_ref, c_ref, *,
                       hidden, seq_len, t_chunk):
    """One grid step = `t_chunk` LSTM timesteps for one batch block.

    xg_ref:     (t_chunk, Nb, 4H) precomputed x@W_ih + b (gate order i,f,g,o).
    w_hh_ref:   (H, 4H) recurrent weights.
    h_last_ref: (Nb, H) output — last hidden state.
    h_ref/c_ref:(Nb, H) f32 state scratch, persistent across time chunks.
    """
    H = hidden
    tc_idx = pl.program_id(1)
    n_t = pl.num_programs(1)

    @pl.when(tc_idx == 0)
    def _init():
        h_ref[...] = jnp.zeros_like(h_ref)
        c_ref[...] = jnp.zeros_like(c_ref)

    # Hoisted weight load: once per grid step, not per unrolled timestep.
    w = w_hh_ref[...]

    def run_chunk(mask_tail):
        def step(s, carry):
            h, c = carry
            gates = (xg_ref[s].astype(jnp.float32)
                     + jnp.dot(h.astype(w.dtype), w,
                               preferred_element_type=jnp.float32))
            # Lane-aligned slices (H is a multiple of 128); interleaved
            # consumption keeps fewer (Nb,H) f32 temporaries live.
            i_g = jax.nn.sigmoid(gates[:, 0 * H:1 * H])
            f_g = jax.nn.sigmoid(gates[:, 1 * H:2 * H])
            c_new = f_g * c + i_g * jnp.tanh(gates[:, 2 * H:3 * H])
            o_g = jax.nn.sigmoid(gates[:, 3 * H:4 * H])
            h_new = o_g * jnp.tanh(c_new)
            if mask_tail:
                valid = (tc_idx * t_chunk + s) < seq_len
                h_new = jnp.where(valid, h_new, h)
                c_new = jnp.where(valid, c_new, c)
            return h_new, c_new

        h, c = lax.fori_loop(0, t_chunk, step, (h_ref[...], c_ref[...]),
                             unroll=True)
        h_ref[...] = h
        c_ref[...] = c

    if seq_len % t_chunk == 0:
        run_chunk(False)                       # no padded timesteps anywhere
    else:
        @pl.when(tc_idx < n_t - 1)
        def _full():
            run_chunk(False)                   # full chunks: no mask at all

        @pl.when(tc_idx == n_t - 1)
        def _tail():
            run_chunk(True)                    # only the tail chunk masks

    @pl.when(tc_idx == n_t - 1)
    def _final():
        h_last_ref[...] = h_ref[...].astype(h_last_ref.dtype)


# ---------------------------------------------------------------------------
# Per-gate kernel: any H (no lane slicing inside a vreg when H % 128 != 0).
# ---------------------------------------------------------------------------
def _lstm_pergate_kernel(xg_ref, w_hh_ref, h_last_ref, h_ref, c_ref, *,
                         seq_len, t_chunk):
    """xg_ref: (t_chunk, 4, Nb, H); w_hh_ref: (4, H, H)."""
    tc_idx = pl.program_id(1)
    n_t = pl.num_programs(1)

    @pl.when(tc_idx == 0)
    def _init():
        h_ref[...] = jnp.zeros_like(h_ref)
        c_ref[...] = jnp.zeros_like(c_ref)

    # Hoisted weight loads: once per grid step, not per unrolled timestep.
    w_i = w_hh_ref[0]
    w_f = w_hh_ref[1]
    w_g = w_hh_ref[2]
    w_o = w_hh_ref[3]
    cdt = w_i.dtype

    def run_chunk(mask_tail):
        def step(s, carry):
            h, c = carry
            x_s = xg_ref[s]                                    # (4, Nb, H)
            h_lo = h.astype(cdt)
            # Interleaved gate computation / consumption.
            i_g = jax.nn.sigmoid(
                x_s[0].astype(jnp.float32)
                + jnp.dot(h_lo, w_i, preferred_element_type=jnp.float32))
            f_g = jax.nn.sigmoid(
                x_s[1].astype(jnp.float32)
                + jnp.dot(h_lo, w_f, preferred_element_type=jnp.float32))
            c_new = f_g * c + i_g * jnp.tanh(
                x_s[2].astype(jnp.float32)
                + jnp.dot(h_lo, w_g, preferred_element_type=jnp.float32))
            o_g = jax.nn.sigmoid(
                x_s[3].astype(jnp.float32)
                + jnp.dot(h_lo, w_o, preferred_element_type=jnp.float32))
            h_new = o_g * jnp.tanh(c_new)
            if mask_tail:
                valid = (tc_idx * t_chunk + s) < seq_len
                h_new = jnp.where(valid, h_new, h)
                c_new = jnp.where(valid, c_new, c)
            return h_new, c_new

        h, c = lax.fori_loop(0, t_chunk, step, (h_ref[...], c_ref[...]),
                             unroll=True)
        h_ref[...] = h
        c_ref[...] = c

    if seq_len % t_chunk == 0:
        run_chunk(False)
    else:
        @pl.when(tc_idx < n_t - 1)
        def _full():
            run_chunk(False)

        @pl.when(tc_idx == n_t - 1)
        def _tail():
            run_chunk(True)

    @pl.when(tc_idx == n_t - 1)
    def _final():
        h_last_ref[...] = h_ref[...].astype(h_last_ref.dtype)


# ---------------------------------------------------------------------------
# Wrapper
# ---------------------------------------------------------------------------
def lstm_model_forward(x, params, *, t_chunk=None, batch_block=None,
                       compute_dtype=jnp.bfloat16, whh_buffering="auto"):
    """x: (N, T, D) batch-first float32. Returns (N, output_dim) float32.

    t_chunk:       timesteps per grid step (unrolled in-kernel). None = auto
                   (derived from the per-generation VMEM budget, capped at 32).
    batch_block:   rows per batch grid block (multiple of 8). None = auto:
                   whole batch on single-TC chips (v5e/v6e), two blocks on v7x
                   so the "parallel" axis shards across both TensorCores.
    compute_dtype: dtype of the streamed xg and the MXU operands (bf16 default;
                   gate math and accumulation are always f32).
    whh_buffering: "auto" (try single-buffered recurrent weights, fall back to
                   double), "single", or "double".  NOTE: the "auto" fallback
                   only triggers for eager calls; under jax.jit pass "double"
                   or "single" explicitly.
    """
    w_ih, w_hh, b = params["w_ih"], params["w_hh"], params["b"]
    fc_w, fc_b = params["fc_w"], params["fc_b"]
    N, T, D = x.shape
    H = w_hh.shape[0]
    fused = (H % 128 == 0)

    vmem_ceiling = int(_vmem_capacity_bytes() * 0.9)
    isz = jnp.dtype(compute_dtype).itemsize

    # ---- batch blocking ----
    if batch_block is None:
        ncores = _detect_num_tensorcores()
        if ncores > 1 and N >= 16:
            Nb = _round_up(-(-N // ncores), 8)      # shard across v7x's 2 TCs
        else:
            Nb = _round_up(N, 8)                    # single block: no overhead
    else:
        Nb = _round_up(max(int(batch_block), 8), 8)
    N_pad = _round_up(max(N, Nb), Nb)

    # ---- time chunking: amortize ~0.35us/grid step, stay inside VMEM ----
    if t_chunk is None:
        per_step = max(1, Nb * 4 * H * isz)
        t_auto = (vmem_ceiling // 3) // (2 * per_step)   # xg double buffer
        t_chunk = int(min(32, max(8, t_auto)))
    t_chunk = max(1, min(int(t_chunk), T))
    T_pad = _round_up(T, t_chunk)

    # ---- Phase 1 (XLA): input projection, produced directly time-major ----
    # Only the small x (N*T*D) is transposed; the big (T,N,4H) projection is
    # written once in its final layout (no extra HBM pass over it).
    x_tm = jnp.transpose(x, (1, 0, 2)).astype(jnp.float32)       # (T, N, D)
    xg = x_tm.reshape(T * N, D) @ w_ih + b                       # one big GEMM

    if fused:
        xg = xg.reshape(T, N, 4 * H)
        xg = jnp.pad(xg, ((0, T_pad - T), (0, N_pad - N), (0, 0)))
        w_hh_k = w_hh.astype(compute_dtype)                      # (H, 4H)
        xg_spec = pl.BlockSpec((t_chunk, Nb, 4 * H),
                               lambda bb, tt: (tt, bb, 0))
        whh_shape = (H, 4 * H)
        whh_map = lambda bb, tt: (0, 0)
        kernel_fn = functools.partial(_lstm_fused_kernel, hidden=H,
                                      seq_len=T, t_chunk=t_chunk)
    else:
        # TODO(synk): the odd-H fallback still does one HBM transpose of the
        # projected activations; the common H % 128 == 0 path avoids it.
        xg = xg.reshape(T, N, 4, H).transpose(0, 2, 1, 3)        # (T, 4, N, H)
        xg = jnp.pad(xg, ((0, T_pad - T), (0, 0), (0, N_pad - N), (0, 0)))
        w_hh_k = w_hh.reshape(H, 4, H).transpose(1, 0, 2).astype(compute_dtype)
        xg_spec = pl.BlockSpec((t_chunk, 4, Nb, H),
                               lambda bb, tt: (tt, 0, bb, 0))
        whh_shape = (4, H, H)
        whh_map = lambda bb, tt: (0, 0, 0)
        kernel_fn = functools.partial(_lstm_pergate_kernel,
                                      seq_len=T, t_chunk=t_chunk)
    xg = xg.astype(compute_dtype)

    n_b = N_pad // Nb
    n_t = T_pad // t_chunk

    # ---- VMEM budget: per-generation ceiling, no artificial 32 MiB cap ----
    vmem_need = (2 * t_chunk * Nb * 4 * H * isz      # xg stream, double buffer
                 + 2 * 4 * H * H * isz               # W_hh (assume 2 buffers)
                 + 2 * Nb * H * 4                    # output block
                 + 2 * Nb * H * 4                    # h/c state scratch
                 + 3 * Nb * 4 * H * 4)               # in-flight gate temps
    vmem_limit = int(max(16 << 20,
                         min(vmem_ceiling, int(1.5 * vmem_need) + (8 << 20))))

    out_spec = pl.BlockSpec((Nb, H), lambda bb, tt: (bb, 0))

    def _run(whh_spec):
        grid_spec = pltpu.PrefetchScalarGridSpec(
            num_scalar_prefetch=0,
            grid=(n_b, n_t),
            in_specs=[xg_spec, whh_spec],
            out_specs=out_spec,
            scratch_shapes=[
                pltpu.VMEM((Nb, H), jnp.float32),    # h state
                pltpu.VMEM((Nb, H), jnp.float32),    # c state
            ],
        )
        return pl.pallas_call(
            kernel_fn,
            out_shape=jax.ShapeDtypeStruct((N_pad, H), jnp.float32),
            grid_spec=grid_spec,
            compiler_params=pltpu.CompilerParams(
                dimension_semantics=("parallel", "arbitrary"),
                vmem_limit_bytes=vmem_limit),
        )(xg, w_hh_k)

    if whh_buffering in ("auto", "single"):
        try:
            # Constant-index-map operand: single-buffer to halve resident VMEM.
            h_last = _run(pl.BlockSpec(whh_shape, whh_map,
                                       pipeline_mode=pl.Buffered(1)))
        except Exception:
            if whh_buffering == "single":
                raise
            h_last = _run(pl.BlockSpec(whh_shape, whh_map))
    else:
        h_last = _run(pl.BlockSpec(whh_shape, whh_map))

    # ---- Phase 3 (XLA): final Linear on the last hidden state ----
    return h_last[:N] @ fc_w + fc_b


def init_params(key, input_dim, hidden_dim, output_dim):
    """PyTorch-style uniform(-1/sqrt(H), 1/sqrt(H)) init."""
    ks = jax.random.split(key, 6)
    bound = 1.0 / jnp.sqrt(jnp.float32(hidden_dim))

    def u(k, shape):
        return jax.random.uniform(k, shape, jnp.float32, -bound, bound)

    # PyTorch stores weight_ih_l0: (4H, D), weight_hh_l0: (4H, H); transpose.
    w_ih = u(ks[0], (4 * hidden_dim, input_dim)).T           # (D, 4H)
    w_hh = u(ks[1], (4 * hidden_dim, hidden_dim)).T          # (H, 4H)
    b_ih = u(ks[2], (4 * hidden_dim,))
    b_hh = u(ks[3], (4 * hidden_dim,))
    b = (b_ih + b_hh).reshape(1, 4 * hidden_dim)             # (1, 4H)
    fc_w = u(ks[4], (output_dim, hidden_dim)).T              # (H, O)
    fc_b = u(ks[5], (output_dim,)).reshape(1, output_dim)    # (1, O)
    return {"w_ih": w_ih, "w_hh": w_hh, "b": b, "fc_w": fc_w, "fc_b": fc_b}


def lstm_model_reference(x, params):
    """Pure-JAX reference (lax.scan) for correctness check."""
    w_ih, w_hh, b = params["w_ih"], params["w_hh"], params["b"]
    fc_w, fc_b = params["fc_w"], params["fc_b"]
    N = x.shape[0]
    H = w_hh.shape[0]

    def step(carry, x_t):
        h, c = carry
        gates = x_t @ w_ih + h @ w_hh + b
        i = jax.nn.sigmoid(gates[:, 0 * H:1 * H])
        f = jax.nn.sigmoid(gates[:, 1 * H:2 * H])
        g = jnp.tanh(gates[:, 2 * H:3 * H])
        o = jax.nn.sigmoid(gates[:, 3 * H:4 * H])
        c = f * c + i * g
        h = o * jnp.tanh(c)
        return (h, c), None

    h0 = jnp.zeros((N, H), jnp.float32)
    c0 = jnp.zeros((N, H), jnp.float32)
    (h_last, _), _ = jax.lax.scan(step, (h0, c0), jnp.transpose(x, (1, 0, 2)))
    return h_last @ fc_w + fc_b


if __name__ == "__main__":
    batch, seq, input_dim, output_dim = 2, 8, 8, 4
    key = jax.random.PRNGKey(0)
    k_x, k_p, k_x2, k_p2 = jax.random.split(key, 4)
    x = jax.random.normal(k_x, (batch, seq, input_dim), jnp.float32)

    # --- per-gate path (H = 32, not a multiple of 128) ---
    params = init_params(k_p, input_dim, 32, output_dim)
    ref = lstm_model_reference(x, params)

    out = jax.block_until_ready(
        lstm_model_forward(x, params, t_chunk=4, compute_dtype=jnp.float32))
    assert out.shape == (batch, output_dim)
    assert jnp.allclose(out, ref, atol=1e-4, rtol=1e-4), (
        f"per-gate f32 t_chunk=4 max abs err {jnp.max(jnp.abs(out - ref))}")

    # time chunk does NOT divide T: exercises padded-tail masking path.
    out2 = jax.block_until_ready(
        lstm_model_forward(x, params, t_chunk=3, compute_dtype=jnp.float32))
    assert jnp.allclose(out2, ref, atol=1e-4, rtol=1e-4), (
        f"per-gate f32 t_chunk=3 max abs err {jnp.max(jnp.abs(out2 - ref))}")

    # --- fused path (H = 128 -> single (Nb,H)x(H,4H) matmul per step) ---
    params2 = init_params(k_p2, input_dim, 128, output_dim)
    ref2 = lstm_model_reference(x, params2)

    out3 = jax.block_until_ready(
        lstm_model_forward(x, params2, t_chunk=8, compute_dtype=jnp.float32))
    assert jnp.allclose(out3, ref2, atol=1e-4, rtol=1e-4), (
        f"fused f32 max abs err {jnp.max(jnp.abs(out3 - ref2))}")

    # default bf16 streaming (f32 gate math) — loose tolerance.
    out4 = jax.block_until_ready(lstm_model_forward(x, params2))
    assert jnp.allclose(out4, ref2, atol=5e-2, rtol=5e-2), (
        f"fused bf16 max abs err {jnp.max(jnp.abs(out4 - ref2))}")

    # multiple batch blocks + fused tail masking (T=8, t_chunk=5).
    x_big = jax.random.normal(k_x2, (12, seq, input_dim), jnp.float32)
    ref3 = lstm_model_reference(x_big, params2)
    out5 = jax.block_until_ready(
        lstm_model_forward(x_big, params2, t_chunk=5, batch_block=8,
                           compute_dtype=jnp.float32))
    assert jnp.allclose(out5, ref3, atol=1e-4, rtol=1e-4), (
        f"multi-block f32 max abs err {jnp.max(jnp.abs(out5 - ref3))}")

    print("KERNEL_OK")
</pallas_src>

<mosaic_0001>
module attributes {stable_mosaic.version = 11 : i64} {
  func.func @_lstm_pergate_kernel(%arg0: i32, %arg1: i32, %arg2: memref<4x4x8x32xf32, #tpu.memory_space<vmem>>, %arg3: memref<4x32x32xf32, #tpu.memory_space<vmem>>, %arg4: memref<8x32xf32, #tpu.memory_space<vmem>>, %arg5: memref<8x32xf32, #tpu.memory_space<vmem>>, %arg6: memref<8x32xf32, #tpu.memory_space<vmem>>) attributes {dimension_semantics = [#tpu.dimension_semantics<parallel>, #tpu.dimension_semantics<arbitrary>], iteration_bounds = array<i64: 1, 2>, scalar_prefetch = 0 : i64, scratch_operands = 2 : i64, tpu.core_type = #tpu.core_type<tc>, window_params = [{transform_indices = @transform_0, window_bounds = array<i64: 4, 4, 8, 32>}, {pipeline_mode = #tpu.pipeline_mode<synchronous>, transform_indices = @transform_1, window_bounds = array<i64: 4, 32, 32>}, {transform_indices = @transform_2, window_bounds = array<i64: 8, 32>}]} {
    %c0_i32 = arith.constant 0 : i32
    %0 = arith.cmpi eq, %arg1, %c0_i32 : i32
    %1 = arith.extui %0 : i1 to i32
    %c0_i32_0 = arith.constant 0 : i32
    %2 = arith.cmpi ne, %1, %c0_i32_0 : i32
    scf.if %2 {
      %cst_59 = arith.constant 0.000000e+00 : f32
      %178 = vector.broadcast %cst_59 : f32 to vector<8x32xf32>
      %c0_60 = arith.constant 0 : index
      %c0_61 = arith.constant 0 : index
      %179 = vector.load %arg5[%c0_60, %c0_61] : memref<8x32xf32, #tpu.memory_space<vmem>>, vector<8x32xf32>
      tpu.vector_store %arg5[%c0_60, %c0_61], %178 {strides = array<i32>} : memref<8x32xf32, #tpu.memory_space<vmem>>, vector<8x32xf32>,
      %cst_62 = arith.constant 0.000000e+00 : f32
      %180 = vector.broadcast %cst_62 : f32 to vector<8x32xf32>
      %c0_63 = arith.constant 0 : index
      %c0_64 = arith.constant 0 : index
      %181 = vector.load %arg6[%c0_63, %c0_64] : memref<8x32xf32, #tpu.memory_space<vmem>>, vector<8x32xf32>
      tpu.vector_store %arg6[%c0_63, %c0_64], %180 {strides = array<i32>} : memref<8x32xf32, #tpu.memory_space<vmem>>, vector<8x32xf32>,
    } else {
    }
    %c0 = arith.constant 0 : index
    %c0_1 = arith.constant 0 : index
    %c0_2 = arith.constant 0 : index
    %3 = vector.load %arg3[%c0, %c0_1, %c0_2] : memref<4x32x32xf32, #tpu.memory_space<vmem>>, vector<1x32x32xf32>
    %4 = vector.shape_cast %3 : vector<1x32x32xf32> to vector<32x32xf32>
    %c1 = arith.constant 1 : index
    %c0_3 = arith.constant 0 : index
    %c0_4 = arith.constant 0 : index
    %5 = vector.load %arg3[%c1, %c0_3, %c0_4] : memref<4x32x32xf32, #tpu.memory_space<vmem>>, vector<1x32x32xf32>
    %6 = vector.shape_cast %5 : vector<1x32x32xf32> to vector<32x32xf32>
    %c2 = arith.constant 2 : index
    %c0_5 = arith.constant 0 : index
    %c0_6 = arith.constant 0 : index
    %7 = vector.load %arg3[%c2, %c0_5, %c0_6] : memref<4x32x32xf32, #tpu.memory_space<vmem>>, vector<1x32x32xf32>
    %8 = vector.shape_cast %7 : vector<1x32x32xf32> to vector<32x32xf32>
    %c3 = arith.constant 3 : index
    %c0_7 = arith.constant 0 : index
    %c0_8 = arith.constant 0 : index
    %9 = vector.load %arg3[%c3, %c0_7, %c0_8] : memref<4x32x32xf32, #tpu.memory_space<vmem>>, vector<1x32x32xf32>
    %10 = vector.shape_cast %9 : vector<1x32x32xf32> to vector<32x32xf32>
    %c0_9 = arith.constant 0 : index
    %c0_10 = arith.constant 0 : index
    %11 = vector.load %arg5[%c0_9, %c0_10] : memref<8x32xf32, #tpu.memory_space<vmem>>, vector<8x32xf32>
    %c0_11 = arith.constant 0 : index
    %c0_12 = arith.constant 0 : index
    %12 = vector.load %arg6[%c0_11, %c0_12] : memref<8x32xf32, #tpu.memory_space<vmem>>, vector<8x32xf32>
    %c0_i32_13 = arith.constant 0 : i32
    %13 = arith.index_cast %c0_i32_13 : i32 to index
    %c0_14 = arith.constant 0 : index
    %c0_15 = arith.constant 0 : index
    %c0_16 = arith.constant 0 : index
    %14 = vector.load %arg2[%13, %c0_14, %c0_15, %c0_16] : memref<4x4x8x32xf32, #tpu.memory_space<vmem>>, vector<1x4x8x32xf32>
    %15 = vector.shape_cast %14 : vector<1x4x8x32xf32> to vector<4x8x32xf32>
    %16 = vector.extract_strided_slice %15 {offsets = [0, 0, 0], sizes = [1, 8, 32], strides = [1, 1, 1]} : vector<4x8x32xf32> to vector<1x8x32xf32>
    %17 = vector.shape_cast %16 : vector<1x8x32xf32> to vector<8x32xf32>
    %cst = arith.constant dense<0.000000e+00> : vector<8x32xf32>
    %18 = tpu.matmul %11, %4, %cst {dimension_numbers = #tpu.dot_dimension_numbers<[1], [0], [0], [1], [0, 0, 1, 1], [], []>} : vector<8x32xf32>, vector<32x32xf32>, vector<8x32xf32> -> vector<8x32xf32>
    %19 = arith.addf %17, %18 : vector<8x32xf32>
    %20 = arith.negf %19 : vector<8x32xf32>
    %21 = math.exp %20 : vector<8x32xf32>
    %cst_17 = arith.constant 1.000000e+00 : f32
    %22 = vector.broadcast %cst_17 : f32 to vector<8x32xf32>
    %23 = arith.addf %22, %21 : vector<8x32xf32>
    %24 = arith.divf %22, %23 : vector<8x32xf32>
    %25 = vector.extract_strided_slice %15 {offsets = [1, 0, 0], sizes = [1, 8, 32], strides = [1, 1, 1]} : vector<4x8x32xf32> to vector<1x8x32xf32>
    %26 = vector.shape_cast %25 : vector<1x8x32xf32> to vector<8x32xf32>
    %cst_18 = arith.constant dense<0.000000e+00> : vector<8x32xf32>
    %27 = tpu.matmul %11, %6, %cst_18 {dimension_numbers = #tpu.dot_dimension_numbers<[1], [0], [0], [1], [0, 0, 1, 1], [], []>} : vector<8x32xf32>, vector<32x32xf32>, vector<8x32xf32> -> vector<8x32xf32>
    %28 = arith.addf %26, %27 : vector<8x32xf32>
    %29 = arith.negf %28 : vector<8x32xf32>
    %30 = math.exp %29 : vector<8x32xf32>
    %cst_19 = arith.constant 1.000000e+00 : f32
    %31 = vector.broadcast %cst_19 : f32 to vector<8x32xf32>
    %32 = arith.addf %31, %30 : vector<8x32xf32>
    %33 = arith.divf %31, %32 : vector<8x32xf32>
    %34 = arith.mulf %33, %12 : vector<8x32xf32>
    %35 = vector.extract_strided_slice %15 {offsets = [2, 0, 0], sizes = [1, 8, 32], strides = [1, 1, 1]} : vector<4x8x32xf32> to vector<1x8x32xf32>
    %36 = vector.shape_cast %35 : vector<1x8x32xf32> to vector<8x32xf32>
    %cst_20 = arith.constant dense<0.000000e+00> : vector<8x32xf32>
    %37 = tpu.matmul %11, %8, %cst_20 {dimension_numbers = #tpu.dot_dimension_numbers<[1], [0], [0], [1], [0, 0, 1, 1], [], []>} : vector<8x32xf32>, vector<32x32xf32>, vector<8x32xf32> -> vector<8x32xf32>
    %38 = arith.addf %36, %37 : vector<8x32xf32>
    %39 = math.tanh %38 : vector<8x32xf32>
    %40 = arith.mulf %24, %39 : vector<8x32xf32>
    %41 = arith.addf %34, %40 : vector<8x32xf32>
    %42 = vector.extract_strided_slice %15 {offsets = [3, 0, 0], sizes = [1, 8, 32], strides = [1, 1, 1]} : vector<4x8x32xf32> to vector<1x8x32xf32>
    %43 = vector.shape_cast %42 : vector<1x8x32xf32> to vector<8x32xf32>
    %cst_21 = arith.constant dense<0.000000e+00> : vector<8x32xf32>
    %44 = tpu.matmul %11, %10, %cst_21 {dimension_numbers = #tpu.dot_dimension_numbers<[1], [0], [0], [1], [0, 0, 1, 1], [], []>} : vector<8x32xf32>, vector<32x32xf32>, vector<8x32xf32> -> vector<8x32xf32>
    %45 = arith.addf %43, %44 : vector<8x32xf32>
    %46 = arith.negf %45 : vector<8x32xf32>
    %47 = math.exp %46 : vector<8x32xf32>
    %cst_22 = arith.constant 1.000000e+00 : f32
    %48 = vector.broadcast %cst_22 : f32 to vector<8x32xf32>
    %49 = arith.addf %48, %47 : vector<8x32xf32>
    %50 = arith.divf %48, %49 : vector<8x32xf32>
    %51 = math.tanh %41 : vector<8x32xf32>
    %52 = arith.mulf %50, %51 : vector<8x32xf32>
    %c1_i32 = arith.constant 1 : i32
    %53 = arith.index_cast %c1_i32 : i32 to index
    %c0_23 = arith.constant 0 : index
    %c0_24 = arith.constant 0 : index
    %c0_25 = arith.constant 0 : index
    %54 = vector.load %arg2[%53, %c0_23, %c0_24, %c0_25] : memref<4x4x8x32xf32, #tpu.memory_space<vmem>>, vector<1x4x8x32xf32>
    %55 = vector.shape_cast %54 : vector<1x4x8x32xf32> to vector<4x8x32xf32>
    %56 = vector.extract_strided_slice %55 {offsets = [0, 0, 0], sizes = [1, 8, 32], strides = [1, 1, 1]} : vector<4x8x32xf32> to vector<1x8x32xf32>
    %57 = vector.shape_cast %56 : vector<1x8x32xf32> to vector<8x32xf32>
    %cst_26 = arith.constant dense<0.000000e+00> : vector<8x32xf32>
    %58 = tpu.matmul %52, %4, %cst_26 {dimension_numbers = #tpu.dot_dimension_numbers<[1], [0], [0], [1], [0, 0, 1, 1], [], []>} : vector<8x32xf32>, vector<32x32xf32>, vector<8x32xf32> -> vector<8x32xf32>
    %59 = arith.addf %57, %58 : vector<8x32xf32>
    %60 = arith.negf %59 : vector<8x32xf32>
    %61 = math.exp %60 : vector<8x32xf32>
    %cst_27 = arith.constant 1.000000e+00 : f32
    %62 = vector.broadcast %cst_27 : f32 to vector<8x32xf32>
    %63 = arith.addf %62, %61 : vector<8x32xf32>
    %64 = arith.divf %62, %63 : vector<8x32xf32>
    %65 = vector.extract_strided_slice %55 {offsets = [1, 0, 0], sizes = [1, 8, 32], strides = [1, 1, 1]} : vector<4x8x32xf32> to vector<1x8x32xf32>
    %66 = vector.shape_cast %65 : vector<1x8x32xf32> to vector<8x32xf32>
    %cst_28 = arith.constant dense<0.000000e+00> : vector<8x32xf32>
    %67 = tpu.matmul %52, %6, %cst_28 {dimension_numbers = #tpu.dot_dimension_numbers<[1], [0], [0], [1], [0, 0, 1, 1], [], []>} : vector<8x32xf32>, vector<32x32xf32>, vector<8x32xf32> -> vector<8x32xf32>
    %68 = arith.addf %66, %67 : vector<8x32xf32>
    %69 = arith.negf %68 : vector<8x32xf32>
    %70 = math.exp %69 : vector<8x32xf32>
    %cst_29 = arith.constant 1.000000e+00 : f32
    %71 = vector.broadcast %cst_29 : f32 to vector<8x32xf32>
    %72 = arith.addf %71, %70 : vector<8x32xf32>
    %73 = arith.divf %71, %72 : vector<8x32xf32>
    %74 = arith.mulf %73, %41 : vector<8x32xf32>
    %75 = vector.extract_strided_slice %55 {offsets = [2, 0, 0], sizes = [1, 8, 32], strides = [1, 1, 1]} : vector<4x8x32xf32> to vector<1x8x32xf32>
    %76 = vector.shape_cast %75 : vector<1x8x32xf32> to vector<8x32xf32>
    %cst_30 = arith.constant dense<0.000000e+00> : vector<8x32xf32>
    %77 = tpu.matmul %52, %8, %cst_30 {dimension_numbers = #tpu.dot_dimension_numbers<[1], [0], [0], [1], [0, 0, 1, 1], [], []>} : vector<8x32xf32>, vector<32x32xf32>, vector<8x32xf32> -> vector<8x32xf32>
    %78 = arith.addf %76, %77 : vector<8x32xf32>
    %79 = math.tanh %78 : vector<8x32xf32>
    %80 = arith.mulf %64, %79 : vector<8x32xf32>
    %81 = arith.addf %74, %80 : vector<8x32xf32>
    %82 = vector.extract_strided_slice %55 {offsets = [3, 0, 0], sizes = [1, 8, 32], strides = [1, 1, 1]} : vector<4x8x32xf32> to vector<1x8x32xf32>
    %83 = vector.shape_cast %82 : vector<1x8x32xf32> to vector<8x32xf32>
    %cst_31 = arith.constant dense<0.000000e+00> : vector<8x32xf32>
    %84 = tpu.matmul %52, %10, %cst_31 {dimension_numbers = #tpu.dot_dimension_numbers<[1], [0], [0], [1], [0, 0, 1, 1], [], []>} : vector<8x32xf32>, vector<32x32xf32>, vector<8x32xf32> -> vector<8x32xf32>
    %85 = arith.addf %83, %84 : vector<8x32xf32>
    %86 = arith.negf %85 : vector<8x32xf32>
    %87 = math.exp %86 : vector<8x32xf32>
    %cst_32 = arith.constant 1.000000e+00 : f32
    %88 = vector.broadcast %cst_32 : f32 to vector<8x32xf32>
    %89 = arith.addf %88, %87 : vector<8x32xf32>
    %90 = arith.divf %88, %89 : vector<8x32xf32>
    %91 = math.tanh %81 : vector<8x32xf32>
    %92 = arith.mulf %90, %91 : vector<8x32xf32>
    %c2_i32 = arith.constant 2 : i32
    %93 = arith.index_cast %c2_i32 : i32 to index
    %c0_33 = arith.constant 0 : index
    %c0_34 = arith.constant 0 : index
    %c0_35 = arith.constant 0 : index
    %94 = vector.load %arg2[%93, %c0_33, %c0_34, %c0_35] : memref<4x4x8x32xf32, #tpu.memory_space<vmem>>, vector<1x4x8x32xf32>
    %95 = vector.shape_cast %94 : vector<1x4x8x32xf32> to vector<4x8x32xf32>
    %96 = vector.extract_strided_slice %95 {offsets = [0, 0, 0], sizes = [1, 8, 32], strides = [1, 1, 1]} : vector<4x8x32xf32> to vector<1x8x32xf32>
    %97 = vector.shape_cast %96 : vector<1x8x32xf32> to vector<8x32xf32>
    %cst_36 = arith.constant dense<0.000000e+00> : vector<8x32xf32>
    %98 = tpu.matmul %92, %4, %cst_36 {dimension_numbers = #tpu.dot_dimension_numbers<[1], [0], [0], [1], [0, 0, 1, 1], [], []>} : vector<8x32xf32>, vector<32x32xf32>, vector<8x32xf32> -> vector<8x32xf32>
    %99 = arith.addf %97, %98 : vector<8x32xf32>
    %100 = arith.negf %99 : vector<8x32xf32>
    %101 = math.exp %100 : vector<8x32xf32>
    %cst_37 = arith.constant 1.000000e+00 : f32
    %102 = vector.broadcast %cst_37 : f32 to vector<8x32xf32>
    %103 = arith.addf %102, %101 : vector<8x32xf32>
    %104 = arith.divf %102, %103 : vector<8x32xf32>
    %105 = vector.extract_strided_slice %95 {offsets = [1, 0, 0], sizes = [1, 8, 32], strides = [1, 1, 1]} : vector<4x8x32xf32> to vector<1x8x32xf32>
    %106 = vector.shape_cast %105 : vector<1x8x32xf32> to vector<8x32xf32>
    %cst_38 = arith.constant dense<0.000000e+00> : vector<8x32xf32>
    %107 = tpu.matmul %92, %6, %cst_38 {dimension_numbers = #tpu.dot_dimension_numbers<[1], [0], [0], [1], [0, 0, 1, 1], [], []>} : vector<8x32xf32>, vector<32x32xf32>, vector<8x32xf32> -> vector<8x32xf32>
    %108 = arith.addf %106, %107 : vector<8x32xf32>
    %109 = arith.negf %108 : vector<8x32xf32>
    %110 = math.exp %109 : vector<8x32xf32>
    %cst_39 = arith.constant 1.000000e+00 : f32
    %111 = vector.broadcast %cst_39 : f32 to vector<8x32xf32>
    %112 = arith.addf %111, %110 : vector<8x32xf32>
    %113 = arith.divf %111, %112 : vector<8x32xf32>
    %114 = arith.mulf %113, %81 : vector<8x32xf32>
    %115 = vector.extract_strided_slice %95 {offsets = [2, 0, 0], sizes = [1, 8, 32], strides = [1, 1, 1]} : vector<4x8x32xf32> to vector<1x8x32xf32>
    %116 = vector.shape_cast %115 : vector<1x8x32xf32> to vector<8x32xf32>
    %cst_40 = arith.constant dense<0.000000e+00> : vector<8x32xf32>
    %117 = tpu.matmul %92, %8, %cst_40 {dimension_numbers = #tpu.dot_dimension_numbers<[1], [0], [0], [1], [0, 0, 1, 1], [], []>} : vector<8x32xf32>, vector<32x32xf32>, vector<8x32xf32> -> vector<8x32xf32>
    %118 = arith.addf %116, %117 : vector<8x32xf32>
    %119 = math.tanh %118 : vector<8x32xf32>
    %120 = arith.mulf %104, %119 : vector<8x32xf32>
    %121 = arith.addf %114, %120 : vector<8x32xf32>
    %122 = vector.extract_strided_slice %95 {offsets = [3, 0, 0], sizes = [1, 8, 32], strides = [1, 1, 1]} : vector<4x8x32xf32> to vector<1x8x32xf32>
    %123 = vector.shape_cast %122 : vector<1x8x32xf32> to vector<8x32xf32>
    %cst_41 = arith.constant dense<0.000000e+00> : vector<8x32xf32>
    %124 = tpu.matmul %92, %10, %cst_41 {dimension_numbers = #tpu.dot_dimension_numbers<[1], [0], [0], [1], [0, 0, 1, 1], [], []>} : vector<8x32xf32>, vector<32x32xf32>, vector<8x32xf32> -> vector<8x32xf32>
    %125 = arith.addf %123, %124 : vector<8x32xf32>
    %126 = arith.negf %125 : vector<8x32xf32>
    %127 = math.exp %126 : vector<8x32xf32>
    %cst_42 = arith.constant 1.000000e+00 : f32
    %128 = vector.broadcast %cst_42 : f32 to vector<8x32xf32>
    %129 = arith.addf %128, %127 : vector<8x32xf32>
    %130 = arith.divf %128, %129 : vector<8x32xf32>
    %131 = math.tanh %121 : vector<8x32xf32>
    %132 = arith.mulf %130, %131 : vector<8x32xf32>
    %c3_i32 = arith.constant 3 : i32
    %133 = arith.index_cast %c3_i32 : i32 to index
    %c0_43 = arith.constant 0 : index
    %c0_44 = arith.constant 0 : index
    %c0_45 = arith.constant 0 : index
    %134 = vector.load %arg2[%133, %c0_43, %c0_44, %c0_45] : memref<4x4x8x32xf32, #tpu.memory_space<vmem>>, vector<1x4x8x32xf32>
    %135 = vector.shape_cast %134 : vector<1x4x8x32xf32> to vector<4x8x32xf32>
    %136 = vector.extract_strided_slice %135 {offsets = [0, 0, 0], sizes = [1, 8, 32], strides = [1, 1, 1]} : vector<4x8x32xf32> to vector<1x8x32xf32>
    %137 = vector.shape_cast %136 : vector<1x8x32xf32> to vector<8x32xf32>
    %cst_46 = arith.constant dense<0.000000e+00> : vector<8x32xf32>
    %138 = tpu.matmul %132, %4, %cst_46 {dimension_numbers = #tpu.dot_dimension_numbers<[1], [0], [0], [1], [0, 0, 1, 1], [], []>} : vector<8x32xf32>, vector<32x32xf32>, vector<8x32xf32> -> vector<8x32xf32>
    %139 = arith.addf %137, %138 : vector<8x32xf32>
    %140 = arith.negf %139 : vector<8x32xf32>
    %141 = math.exp %140 : vector<8x32xf32>
    %cst_47 = arith.constant 1.000000e+00 : f32
    %142 = vector.broadcast %cst_47 : f32 to vector<8x32xf32>
    %143 = arith.addf %142, %141 : vector<8x32xf32>
    %144 = arith.divf %142, %143 : vector<8x32xf32>
    %145 = vector.extract_strided_slice %135 {offsets = [1, 0, 0], sizes = [1, 8, 32], strides = [1, 1, 1]} : vector<4x8x32xf32> to vector<1x8x32xf32>
    %146 = vector.shape_cast %145 : vector<1x8x32xf32> to vector<8x32xf32>
    %cst_48 = arith.constant dense<0.000000e+00> : vector<8x32xf32>
    %147 = tpu.matmul %132, %6, %cst_48 {dimension_numbers = #tpu.dot_dimension_numbers<[1], [0], [0], [1], [0, 0, 1, 1], [], []>} : vector<8x32xf32>, vector<32x32xf32>, vector<8x32xf32> -> vector<8x32xf32>
    %148 = arith.addf %146, %147 : vector<8x32xf32>
    %149 = arith.negf %148 : vector<8x32xf32>
    %150 = math.exp %149 : vector<8x32xf32>
    %cst_49 = arith.constant 1.000000e+00 : f32
    %151 = vector.broadcast %cst_49 : f32 to vector<8x32xf32>
    %152 = arith.addf %151, %150 : vector<8x32xf32>
    %153 = arith.divf %151, %152 : vector<8x32xf32>
    %154 = arith.mulf %153, %121 : vector<8x32xf32>
    %155 = vector.extract_strided_slice %135 {offsets = [2, 0, 0], sizes = [1, 8, 32], strides = [1, 1, 1]} : vector<4x8x32xf32> to vector<1x8x32xf32>
    %156 = vector.shape_cast %155 : vector<1x8x32xf32> to vector<8x32xf32>
    %cst_50 = arith.constant dense<0.000000e+00> : vector<8x32xf32>
    %157 = tpu.matmul %132, %8, %cst_50 {dimension_numbers = #tpu.dot_dimension_numbers<[1], [0], [0], [1], [0, 0, 1, 1], [], []>} : vector<8x32xf32>, vector<32x32xf32>, vector<8x32xf32> -> vector<8x32xf32>
    %158 = arith.addf %156, %157 : vector<8x32xf32>
    %159 = math.tanh %158 : vector<8x32xf32>
    %160 = arith.mulf %144, %159 : vector<8x32xf32>
    %161 = arith.addf %154, %160 : vector<8x32xf32>
    %162 = vector.extract_strided_slice %135 {offsets = [3, 0, 0], sizes = [1, 8, 32], strides = [1, 1, 1]} : vector<4x8x32xf32> to vector<1x8x32xf32>
    %163 = vector.shape_cast %162 : vector<1x8x32xf32> to vector<8x32xf32>
    %cst_51 = arith.constant dense<0.000000e+00> : vector<8x32xf32>
    %164 = tpu.matmul %132, %10, %cst_51 {dimension_numbers = #tpu.dot_dimension_numbers<[1], [0], [0], [1], [0, 0, 1, 1], [], []>} : vector<8x32xf32>, vector<32x32xf32>, vector<8x32xf32> -> vector<8x32xf32>
    %165 = arith.addf %163, %164 : vector<8x32xf32>
    %166 = arith.negf %165 : vector<8x32xf32>
    %167 = math.exp %166 : vector<8x32xf32>
    %cst_52 = arith.constant 1.000000e+00 : f32
    %168 = vector.broadcast %cst_52 : f32 to vector<8x32xf32>
    %169 = arith.addf %168, %167 : vector<8x32xf32>
    %170 = arith.divf %168, %169 : vector<8x32xf32>
    %171 = math.tanh %161 : vector<8x32xf32>
    %172 = arith.mulf %170, %171 : vector<8x32xf32>
    %c4_i32 = arith.constant 4 : i32
    %c0_53 = arith.constant 0 : index
    %c0_54 = arith.constant 0 : index
    %173 = vector.load %arg5[%c0_53, %c0_54] : memref<8x32xf32, #tpu.memory_space<vmem>>, vector<8x32xf32>
    tpu.vector_store %arg5[%c0_53, %c0_54], %172 {strides = array<i32>} : memref<8x32xf32, #tpu.memory_space<vmem>>, vector<8x32xf32>,
    %c0_55 = arith.constant 0 : index
    %c0_56 = arith.constant 0 : index
    %174 = vector.load %arg6[%c0_55, %c0_56] : memref<8x32xf32, #tpu.memory_space<vmem>>, vector<8x32xf32>
    tpu.vector_store %arg6[%c0_55, %c0_56], %161 {strides = array<i32>} : memref<8x32xf32, #tpu.memory_space<vmem>>, vector<8x32xf32>,
    %c1_i32_57 = arith.constant 1 : i32
    %175 = arith.cmpi eq, %arg1, %c1_i32_57 : i32
    %176 = arith.extui %175 : i1 to i32
    %c0_i32_58 = arith.constant 0 : i32
    %177 = arith.cmpi ne, %176, %c0_i32_58 : i32
    scf.if %177 {
      %c0_59 = arith.constant 0 : index
      %c0_60 = arith.constant 0 : index
      %178 = vector.load %arg5[%c0_59, %c0_60] : memref<8x32xf32, #tpu.memory_space<vmem>>, vector<8x32xf32>
      %c0_61 = arith.constant 0 : index
      %c0_62 = arith.constant 0 : index
      %179 = vector.load %arg4[%c0_61, %c0_62] : memref<8x32xf32, #tpu.memory_space<vmem>>, vector<8x32xf32>
      tpu.vector_store %arg4[%c0_61, %c0_62], %178 {strides = array<i32>} : memref<8x32xf32, #tpu.memory_space<vmem>>, vector<8x32xf32>,
    } else {
    }
    return
  }
  func.func @transform_0(%arg0: i32, %arg1: i32) -> (i32, i32, i32, i32) {
    %c0_i32 = arith.constant 0 : i32
    %c0_i32_0 = arith.constant 0 : i32
    %c0_i32_1 = arith.constant 0 : i32
    return %arg1, %c0_i32, %arg0, %c0_i32_0 : i32, i32, i32, i32
  }
  func.func @transform_1(%arg0: i32, %arg1: i32) -> (i32, i32, i32) {
    %c0_i32 = arith.constant 0 : i32
    %c0_i32_0 = arith.constant 0 : i32
    %c0_i32_1 = arith.constant 0 : i32
    %c0_i32_2 = arith.constant 0 : i32
    return %c0_i32, %c0_i32_0, %c0_i32_1 : i32, i32, i32
  }
  func.func @transform_2(%arg0: i32, %arg1: i32) -> (i32, i32) {
    %c0_i32 = arith.constant 0 : i32
    %c0_i32_0 = arith.constant 0 : i32
    return %arg0, %c0_i32 : i32, i32
  }
}

module attributes {stable_mosaic.version = 11 : i64} {
  func.func @_lstm_pergate_kernel(%arg0: i32, %arg1: i32, %arg2: memref<4x4x8x32xf32, #tpu.memory_space<vmem>>, %arg3: memref<4x32x32xf32, #tpu.memory_space<vmem>>, %arg4: memref<8x32xf32, #tpu.memory_space<vmem>>, %arg5: memref<8x32xf32, #tpu.memory_space<vmem>>, %arg6: memref<8x32xf32, #tpu.memory_space<vmem>>) attributes {dimension_semantics = [#tpu.dimension_semantics<parallel>, #tpu.dimension_semantics<arbitrary>], iteration_bounds = array<i64: 1, 2>, scalar_prefetch = 0 : i64, scratch_operands = 2 : i64, tpu.core_type = #tpu.core_type<tc>, window_params = [{transform_indices = @transform_0, window_bounds = array<i64: 4, 4, 8, 32>}, {pipeline_mode = #tpu.pipeline_mode<synchronous>, transform_indices = @transform_1, window_bounds = array<i64: 4, 32, 32>}, {transform_indices = @transform_2, window_bounds = array<i64: 8, 32>}]} {
    %c0_i32 = arith.constant 0 : i32
    %0 = arith.cmpi eq, %arg1, %c0_i32 : i32
    %1 = arith.extui %0 : i1 to i32
    %c0_i32_0 = arith.constant 0 : i32
    %2 = arith.cmpi ne, %1, %c0_i32_0 : i32
    scf.if %2 {
      %cst_59 = arith.constant 0.000000e+00 : f32
      %178 = vector.broadcast %cst_59 : f32 to vector<8x32xf32>
      %c0_60 = arith.constant 0 : index
      %c0_61 = arith.constant 0 : index
      %179 = vector.load %arg5[%c0_60, %c0_61] : memref<8x32xf32, #tpu.memory_space<vmem>>, vector<8x32xf32>
      tpu.vector_store %arg5[%c0_60, %c0_61], %178 {strides = array<i32>} : memref<8x32xf32, #tpu.memory_space<vmem>>, vector<8x32xf32>,
      %cst_62 = arith.constant 0.000000e+00 : f32
      %180 = vector.broadcast %cst_62 : f32 to vector<8x32xf32>
      %c0_63 = arith.constant 0 : index
      %c0_64 = arith.constant 0 : index
      %181 = vector.load %arg6[%c0_63, %c0_64] : memref<8x32xf32, #tpu.memory_space<vmem>>, vector<8x32xf32>
      tpu.vector_store %arg6[%c0_63, %c0_64], %180 {strides = array<i32>} : memref<8x32xf32, #tpu.memory_space<vmem>>, vector<8x32xf32>,
    } else {
    }
    %c0 = arith.constant 0 : index
    %c0_1 = arith.constant 0 : index
    %c0_2 = arith.constant 0 : index
    %3 = vector.load %arg3[%c0, %c0_1, %c0_2] : memref<4x32x32xf32, #tpu.memory_space<vmem>>, vector<1x32x32xf32>
    %4 = vector.shape_cast %3 : vector<1x32x32xf32> to vector<32x32xf32>
    %c1 = arith.constant 1 : index
    %c0_3 = arith.constant 0 : index
    %c0_4 = arith.constant 0 : index
    %5 = vector.load %arg3[%c1, %c0_3, %c0_4] : memref<4x32x32xf32, #tpu.memory_space<vmem>>, vector<1x32x32xf32>
    %6 = vector.shape_cast %5 : vector<1x32x32xf32> to vector<32x32xf32>
    %c2 = arith.constant 2 : index
    %c0_5 = arith.constant 0 : index
    %c0_6 = arith.constant 0 : index
    %7 = vector.load %arg3[%c2, %c0_5, %c0_6] : memref<4x32x32xf32, #tpu.memory_space<vmem>>, vector<1x32x32xf32>
    %8 = vector.shape_cast %7 : vector<1x32x32xf32> to vector<32x32xf32>
    %c3 = arith.constant 3 : index
    %c0_7 = arith.constant 0 : index
    %c0_8 = arith.constant 0 : index
    %9 = vector.load %arg3[%c3, %c0_7, %c0_8] : memref<4x32x32xf32, #tpu.memory_space<vmem>>, vector<1x32x32xf32>
    %10 = vector.shape_cast %9 : vector<1x32x32xf32> to vector<32x32xf32>
    %c0_9 = arith.constant 0 : index
    %c0_10 = arith.constant 0 : index
    %11 = vector.load %arg5[%c0_9, %c0_10] : memref<8x32xf32, #tpu.memory_space<vmem>>, vector<8x32xf32>
    %c0_11 = arith.constant 0 : index
    %c0_12 = arith.constant 0 : index
    %12 = vector.load %arg6[%c0_11, %c0_12] : memref<8x32xf32, #tpu.memory_space<vmem>>, vector<8x32xf32>
    %c0_i32_13 = arith.constant 0 : i32
    %13 = arith.index_cast %c0_i32_13 : i32 to index
    %c0_14 = arith.constant 0 : index
    %c0_15 = arith.constant 0 : index
    %c0_16 = arith.constant 0 : index
    %14 = vector.load %arg2[%13, %c0_14, %c0_15, %c0_16] : memref<4x4x8x32xf32, #tpu.memory_space<vmem>>, vector<1x4x8x32xf32>
    %15 = vector.shape_cast %14 : vector<1x4x8x32xf32> to vector<4x8x32xf32>
    %16 = vector.extract_strided_slice %15 {offsets = [0, 0, 0], sizes = [1, 8, 32], strides = [1, 1, 1]} : vector<4x8x32xf32> to vector<1x8x32xf32>
    %17 = vector.shape_cast %16 : vector<1x8x32xf32> to vector<8x32xf32>
    %cst = arith.constant dense<0.000000e+00> : vector<8x32xf32>
    %18 = tpu.matmul %11, %4, %cst {dimension_numbers = #tpu.dot_dimension_numbers<[1], [0], [0], [1], [0, 0, 1, 1], [], []>} : vector<8x32xf32>, vector<32x32xf32>, vector<8x32xf32> -> vector<8x32xf32>
    %19 = arith.addf %17, %18 : vector<8x32xf32>
    %20 = arith.negf %19 : vector<8x32xf32>
    %21 = math.exp %20 : vector<8x32xf32>
    %cst_17 = arith.constant 1.000000e+00 : f32
    %22 = vector.broadcast %cst_17 : f32 to vector<8x32xf32>
    %23 = arith.addf %22, %21 : vector<8x32xf32>
    %24 = arith.divf %22, %23 : vector<8x32xf32>
    %25 = vector.extract_strided_slice %15 {offsets = [1, 0, 0], sizes = [1, 8, 32], strides = [1, 1, 1]} : vector<4x8x32xf32> to vector<1x8x32xf32>
    %26 = vector.shape_cast %25 : vector<1x8x32xf32> to vector<8x32xf32>
    %cst_18 = arith.constant dense<0.000000e+00> : vector<8x32xf32>
    %27 = tpu.matmul %11, %6, %cst_18 {dimension_numbers = #tpu.dot_dimension_numbers<[1], [0], [0], [1], [0, 0, 1, 1], [], []>} : vector<8x32xf32>, vector<32x32xf32>, vector<8x32xf32> -> vector<8x32xf32>
    %28 = arith.addf %26, %27 : vector<8x32xf32>
    %29 = arith.negf %28 : vector<8x32xf32>
    %30 = math.exp %29 : vector<8x32xf32>
    %cst_19 = arith.constant 1.000000e+00 : f32
    %31 = vector.broadcast %cst_19 : f32 to vector<8x32xf32>
    %32 = arith.addf %31, %30 : vector<8x32xf32>
    %33 = arith.divf %31, %32 : vector<8x32xf32>
    %34 = arith.mulf %33, %12 : vector<8x32xf32>
    %35 = vector.extract_strided_slice %15 {offsets = [2, 0, 0], sizes = [1, 8, 32], strides = [1, 1, 1]} : vector<4x8x32xf32> to vector<1x8x32xf32>
    %36 = vector.shape_cast %35 : vector<1x8x32xf32> to vector<8x32xf32>
    %cst_20 = arith.constant dense<0.000000e+00> : vector<8x32xf32>
    %37 = tpu.matmul %11, %8, %cst_20 {dimension_numbers = #tpu.dot_dimension_numbers<[1], [0], [0], [1], [0, 0, 1, 1], [], []>} : vector<8x32xf32>, vector<32x32xf32>, vector<8x32xf32> -> vector<8x32xf32>
    %38 = arith.addf %36, %37 : vector<8x32xf32>
    %39 = math.tanh %38 : vector<8x32xf32>
    %40 = arith.mulf %24, %39 : vector<8x32xf32>
    %41 = arith.addf %34, %40 : vector<8x32xf32>
    %42 = vector.extract_strided_slice %15 {offsets = [3, 0, 0], sizes = [1, 8, 32], strides = [1, 1, 1]} : vector<4x8x32xf32> to vector<1x8x32xf32>
    %43 = vector.shape_cast %42 : vector<1x8x32xf32> to vector<8x32xf32>
    %cst_21 = arith.constant dense<0.000000e+00> : vector<8x32xf32>
    %44 = tpu.matmul %11, %10, %cst_21 {dimension_numbers = #tpu.dot_dimension_numbers<[1], [0], [0], [1], [0, 0, 1, 1], [], []>} : vector<8x32xf32>, vector<32x32xf32>, vector<8x32xf32> -> vector<8x32xf32>
    %45 = arith.addf %43, %44 : vector<8x32xf32>
    %46 = arith.negf %45 : vector<8x32xf32>
    %47 = math.exp %46 : vector<8x32xf32>
    %cst_22 = arith.constant 1.000000e+00 : f32
    %48 = vector.broadcast %cst_22 : f32 to vector<8x32xf32>
    %49 = arith.addf %48, %47 : vector<8x32xf32>
    %50 = arith.divf %48, %49 : vector<8x32xf32>
    %51 = math.tanh %41 : vector<8x32xf32>
    %52 = arith.mulf %50, %51 : vector<8x32xf32>
    %c1_i32 = arith.constant 1 : i32
    %53 = arith.index_cast %c1_i32 : i32 to index
    %c0_23 = arith.constant 0 : index
    %c0_24 = arith.constant 0 : index
    %c0_25 = arith.constant 0 : index
    %54 = vector.load %arg2[%53, %c0_23, %c0_24, %c0_25] : memref<4x4x8x32xf32, #tpu.memory_space<vmem>>, vector<1x4x8x32xf32>
    %55 = vector.shape_cast %54 : vector<1x4x8x32xf32> to vector<4x8x32xf32>
    %56 = vector.extract_strided_slice %55 {offsets = [0, 0, 0], sizes = [1, 8, 32], strides = [1, 1, 1]} : vector<4x8x32xf32> to vector<1x8x32xf32>
    %57 = vector.shape_cast %56 : vector<1x8x32xf32> to vector<8x32xf32>
    %cst_26 = arith.constant dense<0.000000e+00> : vector<8x32xf32>
    %58 = tpu.matmul %52, %4, %cst_26 {dimension_numbers = #tpu.dot_dimension_numbers<[1], [0], [0], [1], [0, 0, 1, 1], [], []>} : vector<8x32xf32>, vector<32x32xf32>, vector<8x32xf32> -> vector<8x32xf32>
    %59 = arith.addf %57, %58 : vector<8x32xf32>
    %60 = arith.negf %59 : vector<8x32xf32>
    %61 = math.exp %60 : vector<8x32xf32>
    %cst_27 = arith.constant 1.000000e+00 : f32
    %62 = vector.broadcast %cst_27 : f32 to vector<8x32xf32>
    %63 = arith.addf %62, %61 : vector<8x32xf32>
    %64 = arith.divf %62, %63 : vector<8x32xf32>
    %65 = vector.extract_strided_slice %55 {offsets = [1, 0, 0], sizes = [1, 8, 32], strides = [1, 1, 1]} : vector<4x8x32xf32> to vector<1x8x32xf32>
    %66 = vector.shape_cast %65 : vector<1x8x32xf32> to vector<8x32xf32>
    %cst_28 = arith.constant dense<0.000000e+00> : vector<8x32xf32>
    %67 = tpu.matmul %52, %6, %cst_28 {dimension_numbers = #tpu.dot_dimension_numbers<[1], [0], [0], [1], [0, 0, 1, 1], [], []>} : vector<8x32xf32>, vector<32x32xf32>, vector<8x32xf32> -> vector<8x32xf32>
    %68 = arith.addf %66, %67 : vector<8x32xf32>
    %69 = arith.negf %68 : vector<8x32xf32>
    %70 = math.exp %69 : vector<8x32xf32>
    %cst_29 = arith.constant 1.000000e+00 : f32
    %71 = vector.broadcast %cst_29 : f32 to vector<8x32xf32>
    %72 = arith.addf %71, %70 : vector<8x32xf32>
    %73 = arith.divf %71, %72 : vector<8x32xf32>
    %74 = arith.mulf %73, %41 : vector<8x32xf32>
    %75 = vector.extract_strided_slice %55 {offsets = [2, 0, 0], sizes = [1, 8, 32], strides = [1, 1, 1]} : vector<4x8x32xf32> to vector<1x8x32xf32>
    %76 = vector.shape_cast %75 : vector<1x8x32xf32> to vector<8x32xf32>
    %cst_30 = arith.constant dense<0.000000e+00> : vector<8x32xf32>
    %77 = tpu.matmul %52, %8, %cst_30 {dimension_numbers = #tpu.dot_dimension_numbers<[1], [0], [0], [1], [0, 0, 1, 1], [], []>} : vector<8x32xf32>, vector<32x32xf32>, vector<8x32xf32> -> vector<8x32xf32>
    %78 = arith.addf %76, %77 : vector<8x32xf32>
    %79 = math.tanh %78 : vector<8x32xf32>
    %80 = arith.mulf %64, %79 : vector<8x32xf32>
    %81 = arith.addf %74, %80 : vector<8x32xf32>
    %82 = vector.extract_strided_slice %55 {offsets = [3, 0, 0], sizes = [1, 8, 32], strides = [1, 1, 1]} : vector<4x8x32xf32> to vector<1x8x32xf32>
    %83 = vector.shape_cast %82 : vector<1x8x32xf32> to vector<8x32xf32>
    %cst_31 = arith.constant dense<0.000000e+00> : vector<8x32xf32>
    %84 = tpu.matmul %52, %10, %cst_31 {dimension_numbers = #tpu.dot_dimension_numbers<[1], [0], [0], [1], [0, 0, 1, 1], [], []>} : vector<8x32xf32>, vector<32x32xf32>, vector<8x32xf32> -> vector<8x32xf32>
    %85 = arith.addf %83, %84 : vector<8x32xf32>
    %86 = arith.negf %85 : vector<8x32xf32>
    %87 = math.exp %86 : vector<8x32xf32>
    %cst_32 = arith.constant 1.000000e+00 : f32
    %88 = vector.broadcast %cst_32 : f32 to vector<8x32xf32>
    %89 = arith.addf %88, %87 : vector<8x32xf32>
    %90 = arith.divf %88, %89 : vector<8x32xf32>
    %91 = math.tanh %81 : vector<8x32xf32>
    %92 = arith.mulf %90, %91 : vector<8x32xf32>
    %c2_i32 = arith.constant 2 : i32
    %93 = arith.index_cast %c2_i32 : i32 to index
    %c0_33 = arith.constant 0 : index
    %c0_34 = arith.constant 0 : index
    %c0_35 = arith.constant 0 : index
    %94 = vector.load %arg2[%93, %c0_33, %c0_34, %c0_35] : memref<4x4x8x32xf32, #tpu.memory_space<vmem>>, vector<1x4x8x32xf32>
    %95 = vector.shape_cast %94 : vector<1x4x8x32xf32> to vector<4x8x32xf32>
    %96 = vector.extract_strided_slice %95 {offsets = [0, 0, 0], sizes = [1, 8, 32], strides = [1, 1, 1]} : vector<4x8x32xf32> to vector<1x8x32xf32>
    %97 = vector.shape_cast %96 : vector<1x8x32xf32> to vector<8x32xf32>
    %cst_36 = arith.constant dense<0.000000e+00> : vector<8x32xf32>
    %98 = tpu.matmul %92, %4, %cst_36 {dimension_numbers = #tpu.dot_dimension_numbers<[1], [0], [0], [1], [0, 0, 1, 1], [], []>} : vector<8x32xf32>, vector<32x32xf32>, vector<8x32xf32> -> vector<8x32xf32>
    %99 = arith.addf %97, %98 : vector<8x32xf32>
    %100 = arith.negf %99 : vector<8x32xf32>
    %101 = math.exp %100 : vector<8x32xf32>
    %cst_37 = arith.constant 1.000000e+00 : f32
    %102 = vector.broadcast %cst_37 : f32 to vector<8x32xf32>
    %103 = arith.addf %102, %101 : vector<8x32xf32>
    %104 = arith.divf %102, %103 : vector<8x32xf32>
    %105 = vector.extract_strided_slice %95 {offsets = [1, 0, 0], sizes = [1, 8, 32], strides = [1, 1, 1]} : vector<4x8x32xf32> to vector<1x8x32xf32>
    %106 = vector.shape_cast %105 : vector<1x8x32xf32> to vector<8x32xf32>
    %cst_38 = arith.constant dense<0.000000e+00> : vector<8x32xf32>
    %107 = tpu.matmul %92, %6, %cst_38 {dimension_numbers = #tpu.dot_dimension_numbers<[1], [0], [0], [1], [0, 0, 1, 1], [], []>} : vector<8x32xf32>, vector<32x32xf32>, vector<8x32xf32> -> vector<8x32xf32>
    %108 = arith.addf %106, %107 : vector<8x32xf32>
    %109 = arith.negf %108 : vector<8x32xf32>
    %110 = math.exp %109 : vector<8x32xf32>
    %cst_39 = arith.constant 1.000000e+00 : f32
    %111 = vector.broadcast %cst_39 : f32 to vector<8x32xf32>
    %112 = arith.addf %111, %110 : vector<8x32xf32>
    %113 = arith.divf %111, %112 : vector<8x32xf32>
    %114 = arith.mulf %113, %81 : vector<8x32xf32>
    %115 = vector.extract_strided_slice %95 {offsets = [2, 0, 0], sizes = [1, 8, 32], strides = [1, 1, 1]} : vector<4x8x32xf32> to vector<1x8x32xf32>
    %116 = vector.shape_cast %115 : vector<1x8x32xf32> to vector<8x32xf32>
    %cst_40 = arith.constant dense<0.000000e+00> : vector<8x32xf32>
    %117 = tpu.matmul %92, %8, %cst_40 {dimension_numbers = #tpu.dot_dimension_numbers<[1], [0], [0], [1], [0, 0, 1, 1], [], []>} : vector<8x32xf32>, vector<32x32xf32>, vector<8x32xf32> -> vector<8x32xf32>
    %118 = arith.addf %116, %117 : vector<8x32xf32>
    %119 = math.tanh %118 : vector<8x32xf32>
    %120 = arith.mulf %104, %119 : vector<8x32xf32>
    %121 = arith.addf %114, %120 : vector<8x32xf32>
    %122 = vector.extract_strided_slice %95 {offsets = [3, 0, 0], sizes = [1, 8, 32], strides = [1, 1, 1]} : vector<4x8x32xf32> to vector<1x8x32xf32>
    %123 = vector.shape_cast %122 : vector<1x8x32xf32> to vector<8x32xf32>
    %cst_41 = arith.constant dense<0.000000e+00> : vector<8x32xf32>
    %124 = tpu.matmul %92, %10, %cst_41 {dimension_numbers = #tpu.dot_dimension_numbers<[1], [0], [0], [1], [0, 0, 1, 1], [], []>} : vector<8x32xf32>, vector<32x32xf32>, vector<8x32xf32> -> vector<8x32xf32>
    %125 = arith.addf %123, %124 : vector<8x32xf32>
    %126 = arith.negf %125 : vector<8x32xf32>
    %127 = math.exp %126 : vector<8x32xf32>
    %cst_42 = arith.constant 1.000000e+00 : f32
    %128 = vector.broadcast %cst_42 : f32 to vector<8x32xf32>
    %129 = arith.addf %128, %127 : vector<8x32xf32>
    %130 = arith.divf %128, %129 : vector<8x32xf32>
    %131 = math.tanh %121 : vector<8x32xf32>
    %132 = arith.mulf %130, %131 : vector<8x32xf32>
    %c3_i32 = arith.constant 3 : i32
    %133 = arith.index_cast %c3_i32 : i32 to index
    %c0_43 = arith.constant 0 : index
    %c0_44 = arith.constant 0 : index
    %c0_45 = arith.constant 0 : index
    %134 = vector.load %arg2[%133, %c0_43, %c0_44, %c0_45] : memref<4x4x8x32xf32, #tpu.memory_space<vmem>>, vector<1x4x8x32xf32>
    %135 = vector.shape_cast %134 : vector<1x4x8x32xf32> to vector<4x8x32xf32>
    %136 = vector.extract_strided_slice %135 {offsets = [0, 0, 0], sizes = [1, 8, 32], strides = [1, 1, 1]} : vector<4x8x32xf32> to vector<1x8x32xf32>
    %137 = vector.shape_cast %136 : vector<1x8x32xf32> to vector<8x32xf32>
    %cst_46 = arith.constant dense<0.000000e+00> : vector<8x32xf32>
    %138 = tpu.matmul %132, %4, %cst_46 {dimension_numbers = #tpu.dot_dimension_numbers<[1], [0], [0], [1], [0, 0, 1, 1], [], []>} : vector<8x32xf32>, vector<32x32xf32>, vector<8x32xf32> -> vector<8x32xf32>
    %139 = arith.addf %137, %138 : vector<8x32xf32>
    %140 = arith.negf %139 : vector<8x32xf32>
    %141 = math.exp %140 : vector<8x32xf32>
    %cst_47 = arith.constant 1.000000e+00 : f32
    %142 = vector.broadcast %cst_47 : f32 to vector<8x32xf32>
    %143 = arith.addf %142, %141 : vector<8x32xf32>
    %144 = arith.divf %142, %143 : vector<8x32xf32>
    %145 = vector.extract_strided_slice %135 {offsets = [1, 0, 0], sizes = [1, 8, 32], strides = [1, 1, 1]} : vector<4x8x32xf32> to vector<1x8x32xf32>
    %146 = vector.shape_cast %145 : vector<1x8x32xf32> to vector<8x32xf32>
    %cst_48 = arith.constant dense<0.000000e+00> : vector<8x32xf32>
    %147 = tpu.matmul %132, %6, %cst_48 {dimension_numbers = #tpu.dot_dimension_numbers<[1], [0], [0], [1], [0, 0, 1, 1], [], []>} : vector<8x32xf32>, vector<32x32xf32>, vector<8x32xf32> -> vector<8x32xf32>
    %148 = arith.addf %146, %147 : vector<8x32xf32>
    %149 = arith.negf %148 : vector<8x32xf32>
    %150 = math.exp %149 : vector<8x32xf32>
    %cst_49 = arith.constant 1.000000e+00 : f32
    %151 = vector.broadcast %cst_49 : f32 to vector<8x32xf32>
    %152 = arith.addf %151, %150 : vector<8x32xf32>
    %153 = arith.divf %151, %152 : vector<8x32xf32>
    %154 = arith.mulf %153, %121 : vector<8x32xf32>
    %155 = vector.extract_strided_slice %135 {offsets = [2, 0, 0], sizes = [1, 8, 32], strides = [1, 1, 1]} : vector<4x8x32xf32> to vector<1x8x32xf32>
    %156 = vector.shape_cast %155 : vector<1x8x32xf32> to vector<8x32xf32>
    %cst_50 = arith.constant dense<0.000000e+00> : vector<8x32xf32>
    %157 = tpu.matmul %132, %8, %cst_50 {dimension_numbers = #tpu.dot_dimension_numbers<[1], [0], [0], [1], [0, 0, 1, 1], [], []>} : vector<8x32xf32>, vector<32x32xf32>, vector<8x32xf32> -> vector<8x32xf32>
    %158 = arith.addf %156, %157 : vector<8x32xf32>
    %159 = math.tanh %158 : vector<8x32xf32>
    %160 = arith.mulf %144, %159 : vector<8x32xf32>
    %161 = arith.addf %154, %160 : vector<8x32xf32>
    %162 = vector.extract_strided_slice %135 {offsets = [3, 0, 0], sizes = [1, 8, 32], strides = [1, 1, 1]} : vector<4x8x32xf32> to vector<1x8x32xf32>
    %163 = vector.shape_cast %162 : vector<1x8x32xf32> to vector<8x32xf32>
    %cst_51 = arith.constant dense<0.000000e+00> : vector<8x32xf32>
    %164 = tpu.matmul %132, %10, %cst_51 {dimension_numbers = #tpu.dot_dimension_numbers<[1], [0], [0], [1], [0, 0, 1, 1], [], []>} : vector<8x32xf32>, vector<32x32xf32>, vector<8x32xf32> -> vector<8x32xf32>
    %165 = arith.addf %163, %164 : vector<8x32xf32>
    %166 = arith.negf %165 : vector<8x32xf32>
    %167 = math.exp %166 : vector<8x32xf32>
    %cst_52 = arith.constant 1.000000e+00 : f32
    %168 = vector.broadcast %cst_52 : f32 to vector<8x32xf32>
    %169 = arith.addf %168, %167 : vector<8x32xf32>
    %170 = arith.divf %168, %169 : vector<8x32xf32>
    %171 = math.tanh %161 : vector<8x32xf32>
    %172 = arith.mulf %170, %171 : vector<8x32xf32>
    %c4_i32 = arith.constant 4 : i32
    %c0_53 = arith.constant 0 : index
    %c0_54 = arith.constant 0 : index
    %173 = vector.load %arg5[%c0_53, %c0_54] : memref<8x32xf32, #tpu.memory_space<vmem>>, vector<8x32xf32>
    tpu.vector_store %arg5[%c0_53, %c0_54], %172 {strides = array<i32>} : memref<8x32xf32, #tpu.memory_space<vmem>>, vector<8x32xf32>,
    %c0_55 = arith.constant 0 : index
    %c0_56 = arith.constant 0 : index
    %174 = vector.load %arg6[%c0_55, %c0_56] : memref<8x32xf32, #tpu.memory_space<vmem>>, vector<8x32xf32>
    tpu.vector_store %arg6[%c0_55, %c0_56], %161 {strides = array<i32>} : memref<8x32xf32, #tpu.memory_space<vmem>>, vector<8x32xf32>,
    %c1_i32_57 = arith.constant 1 : i32
    %175 = arith.cmpi eq, %arg1, %c1_i32_57 : i32
    %176 = arith.extui %175 : i1 to i32
    %c0_i32_58 = arith.constant 0 : i32
    %177 = arith.cmpi ne, %176, %c0_i32_58 : i32
    scf.if %177 {
      %c0_59 = arith.constant 0 : index
      %c0_60 = arith.constant 0 : index
      %178 = vector.load %arg5[%c0_59, %c0_60] : memref<8x32xf32, #tpu.memory_space<vmem>>, vector<8x32xf32>
      %c0_61 = arith.constant 0 : index
      %c0_62 = arith.constant 0 : index
      %179 = vector.load %arg4[%c0_61, %c0_62] : memref<8x32xf32, #tpu.memory_space<vmem>>, vector<8x32xf32>
      tpu.vector_store %arg4[%c0_61, %c0_62], %178 {strides = array<i32>} : memref<8x32xf32, #tpu.memory_space<vmem>>, vector<8x32xf32>,
    } else {
    }
    return
  }
  func.func @transform_0(%arg0: i32, %arg1: i32) -> (i32, i32, i32, i32) {
    %c0_i32 = arith.constant 0 : i32
    %c0_i32_0 = arith.constant 0 : i32
    %c0_i32_1 = arith.constant 0 : i32
    return %arg1, %c0_i32, %arg0, %c0_i32_0 : i32, i32, i32, i32
  }
  func.func @transform_1(%arg0: i32, %arg1: i32) -> (i32, i32, i32) {
    %c0_i32 = arith.constant 0 : i32
    %c0_i32_0 = arith.constant 0 : i32
    %c0_i32_1 = arith.constant 0 : i32
    %c0_i32_2 = arith.constant 0 : i32
    return %c0_i32, %c0_i32_0, %c0_i32_1 : i32, i32, i32
  }
  func.func @transform_2(%arg0: i32, %arg1: i32) -> (i32, i32) {
    %c0_i32 = arith.constant 0 : i32
    %c0_i32_0 = arith.constant 0 : i32
    return %arg0, %c0_i32 : i32, i32
  }
}

</mosaic_0001>

<bundles_post_ra>
// kernel: tpu_custom_call.1
= control target key start
LH: loop header
LB: loop body
LE: loop exit
PB: predicated region body
PF: predicated region fallthrough
CT: control target
= control target key end

     0   :  { %7 = vsyncpa [#allocation5], 0  ;;  %s2639_s0 = inlined_call_operand.hbm [shape: f32[8,4,8,32], index: 0, kind: input, shape index: {}]   ;;  %s2640_s1 = inlined_call_operand.hbm [shape: f32[4,32,32], index: 1, kind: input, shape index: {}]   ;;  %s2641_s2 = inlined_call_operand.hbm [shape: f32[8,32], index: 2, kind: output, shape index: {}]  }
   0x1   :  { %9 = vsyncpa [#allocation5 + $0x1], 0 }
   0x2   :  { %10 = vsyncpa [#allocation8], 0 }
   0x3   :  { %11 = vsyncpa [#allocation6], 0  ;;  %s2291_s9 = smov 0   ;;  %s2293_s10 = smov 0  }
   0x4   :  { %s2295_s11 = smov 0   ;;  %s2297_s12 = smov 0  }
   0x5   :  { %s2299_s13 = smov 0   ;;  %s2301_s14 = smov 0  }
   0x6 LB: > { %s1569_s15 = sadd.s32 4294967295, %s2265_s14   ;;  %p51_p0 = scmp.ne.s32.totalorder %s2249_s10, %s2245_s9  ;;  %s2265_s14 = sphi %s2301_s14, %s17_s14   ;;  %s2261_s13 = sphi %s2299_s13, %s2659_s13   ;;  %s2257_s12 = sphi %s2297_s12, %s2658_s12   ;;  %s2253_s11 = sphi %s2295_s11, %s2657_s11   ;;  %s2249_s10 = sphi %s2293_s10, %s2656_s10   ;;  %s2245_s9 = sphi %s2291_s9, %s2655_s9  }
   0x7   : > { %p2323_p1 = scmp.eq.s32.totalorder %s1569_s15, 0  ;;  %p1570_p2 = scmp.ge.s32.totalorder %s2265_s14, 1 }
   0x8   : > { %p109_p3 = scmp.lt.s32.totalorder %s2265_s14, 3  ;;  %s2267_s19 = smov [#allocation7]  }
   0x9   : > { %s2646_s16 = scalar_select %p2323_p1, 1, 0 }
   0xa   : > { %p2331_p4 = por %p2323_p1, %p51_p0  ;;  %p2335_p5 = pnand %p1570_p2, %p109_p3 }
   0xb   : > { %s121_s20 = sshll.u32 %s2267_s19, 4  ;;  %s26_s22 = sadd.s32 1, %s2261_s13  ;;  %s122_s20 = int_to_ptr.vmem [resolvable:$true] %s121_s20 }
   0xc   : > { %s2647_s17 = scalar_select %p2331_p4, 1, 0 }
   0xd   : > { %s2648_s18 = scalar_select %p2335_p5, 1, 0 }
   0xe   : > { %p1990_p6 = pneg %p2335_p5  ;;  %s2123_s25 = scalar_lea.hbm %s2640_s1, 2048 }
   0xf   : > { %p2124_p8 = scmp.ne.s32.totalorder %s2640_s1, %s2123_s25  ;;  %p2130_p12 = scmp.lt.u32.totalorder %s2123_s25, %s2640_s1 }
  0x10   : > { %p2343_p7 = pnand %p1990_p6, %p2323_p1 }
  0x12   : > { %p2125_p9 = pneg %p2343_p7 }
  0x14   : > { %p2126_p10 = pnand %p2125_p9, %p2124_p8 }
  0x16   : > { %p2127_p11 = pneg %p2126_p10 }
  0x18   : > { %p2132_p13 = pnand %p2130_p12, %p2127_p11 }
  0x1a   : > { %2135 = shalt.err (!%p2132_p13)
}
  0x1b   : > { %s2136_s30 = scalar_lea.vmem %s122_s20, 2048  ;;  %p2144_p6 = scmp.lt.s32.totalorder %s122_s20, %s122_s20 }
  0x1c   : > { %p2137_p0 = scmp.ne.s32.totalorder %s122_s20, %s2136_s30  ;;  %p2145_p1 = scmp.lt.s32.totalorder %s2136_s30, %s2136_s30 }
  0x1e   : > { %p2139_p2 = pnand %p2137_p0, %p2125_p9  ;;  %p2146_p4 = por %p2145_p1, %p2144_p6 }
  0x20   : > { %p2140_p3 = pneg %p2139_p2 }
  0x22   : > { %p2147_p5 = pnand %p2146_p4, %p2140_p3 }
  0x24   : > { %2150 = shalt.err (!%p2147_p5)
}
  0x25   : > { %s2268_s3 = smov 128   ;;  %s2269_s4 = smov 8  }
  0x26   : > { %1993 = dma.hbm_to_vmem [thread:$0]  (!%p2343_p7), %s2640_s1, 2048, %s122_s20, [#allocation8], %s2268_s3, %s2268_s3, %s2269_s4  }
  0x27   : > { %p27_p1 = scmp.ge.s32.totalorder %s26_s22, 2  ;;  %s38_s7 = sadd.s32 1, %s2253_s11 }
  0x28   : > { %p45_p4 = scmp.ne.s32.totalorder %s2253_s11, %s2249_s10  ;;  %p46_p5 = scmp.eq.s32.totalorder %s2265_s14, 0 }
  0x29   : > { %s2661_s22 = smov (%p27_p1, %s26_s22), 0  ;;  %p1999_p9 = scmp.lt.s32.totalorder %s2265_s14, 2 }
  0x2a   : > { %p47_p8 = por %p46_p5, %p45_p4  ;;  %s33_s8 = ssub.s32 %s2261_s13, %s2661_s22 }
  0x2b   : > { %s135_s9 = sand.u32 1, %s2253_s11   ;;  %p36_p10 = scmp.eq.s32.totalorder %s33_s8, 0 }
  0x2c   : > { %s1573_s19 = sshll.u32 %s135_s9, 7  ;;  %s1627_s21 = sshll.u32 %s2261_s13, 11 }
  0x2d   : > { %s2379_s23 = scalar_select %p36_p10, %s2253_s11, %s38_s7  }
  0x2e   : > { %s2384_s20 = scalar_lea.hbm %s2639_s0, %s1627_s21  ;;  %s139_s26 = scalar_lea.vmem [#allocation4], %s1573_s19 }
  0x2f   : > { %s148_s27 = sshll.u32 %s139_s26, 4  ;;  %p2386_p7 = pnand %p1999_p9, %p47_p8  ;;  %s2390_s27 = int_to_ptr.vmem [resolvable:$true] %s148_s27 }
  0x30   : > { %s2392_s29 = scalar_lea.sflag [#allocation5], %s135_s9  ;;  %s2151_s30 = scalar_lea.hbm %s2384_s20, 2048 }
  0x31   : > { %p2152_p11 = scmp.ne.s32.totalorder %s2384_s20, %s2151_s30  ;;  %p2153_p12 = pneg %p2386_p7 }
  0x32   : > { %s2156_s7 = scalar_lea.hbm %s2639_s0, 4096  ;;  %p2157_p2 = scmp.lt.u32.totalorder %s2384_s20, %s2639_s0 }
  0x33   : > { %p2154_p13 = pnand %p2153_p12, %p2152_p11  ;;  %p2158_p3 = scmp.lt.u32.totalorder %s2156_s7, %s2151_s30 }
  0x34   : > { %p2160_p1 = scmp.lt.u32.totalorder %s2151_s30, %s2384_s20 }
  0x35   : > { %p2155_p0 = pneg %p2154_p13  ;;  %p2159_p6 = por %p2158_p3, %p2157_p2 }
  0x37   : > { %p2161_p4 = por %p2160_p1, %p2159_p6 }
  0x39   : > { %p2162_p5 = pnand %p2161_p4, %p2155_p0 }
  0x3b   : > { %2165 = shalt.err (!%p2162_p5)
}
  0x3c   : > { %s2166_s9 = scalar_lea.vmem %s2390_s27, 2048  ;;  %s2270_s21 = smov [#allocation4]  }
  0x3d   : > { %p2167_p8 = scmp.ne.s32.totalorder %s2390_s27, %s2166_s9  ;;  %s2171_s24 = sshll.u32 %s2270_s21, 4  ;;  %s2172_s24 = int_to_ptr.vmem [resolvable:$false] %s2171_s24 }
  0x3e   : > { %s2173_s25 = scalar_lea.vmem %s2172_s24, 4096  ;;  %p2174_p11 = scmp.lt.s32.totalorder %s2390_s27, %s2172_s24 }
  0x3f   : > { %p2169_p9 = pnand %p2167_p8, %p2153_p12  ;;  %p2175_p13 = scmp.lt.s32.totalorder %s2173_s25, %s2166_s9 }
  0x41   : > { %p2170_p10 = pneg %p2169_p9  ;;  %p2176_p2 = por %p2175_p13, %p2174_p11 }
  0x43   : > { %p2177_p3 = pnand %p2176_p2, %p2170_p10 }
  0x45   : > { %2180 = shalt.err (!%p2177_p3)
}
  0x46   : > { %1997 = dma.hbm_to_vmem [thread:$0]  (!%p2386_p7), %s2384_s20, 2048, %s2390_s27, %s2392_s29, %s2268_s3, %s2268_s3, %s2269_s4  }
  0x47   : > { %p2651_p12 = scmp.ne.s32.totalorder %s2648_s18, 0 }
  0x48   : > { %s162_s26 = sand.u32 (!%p2651_p12), 1, %s2249_s10   ;;  %p2652_p0 = scmp.ne.s32.totalorder (!%p2651_p12), %s2647_s17, 0 }
  0x49   : > { %160 = sbr.rel (%p2651_p12) target bundleno = 1169 (0x491), region = 28  ;;  %s1578_s30 = sshll.u32 (!%p2651_p12), %s162_s26, 7 }
  0x4a   : > { %s163_s5 = scalar_lea.sflag (!%p2651_p12), [#allocation5], %s162_s26  ;;  %s2426_s6 = scalar_lea.vmem (!%p2651_p12), [#allocation4], %s1578_s30 }
  0x50   : > { %2232 = dma.done.wait (%p2652_p0), %s163_s5, 2048  }
  0x51   : > { %2234 = vsyncadd (%p2652_p0), %s163_s5, 4294965248  ;;  %p2653_p6 = scmp.ne.s32.totalorder %s2646_s16, 0 }
  0x53   : > { %2236 = dma.done.wait (%p2653_p6), [#allocation8], 2048  }
  0x54   : > { %2238 = vsyncadd (%p2653_p6), [#allocation8], 4294965248  ;;  %p1580_p7 = scmp.ne.s32.totalorder %s2257_s12, 0 }
  0x55   : > { %vm191_vm0 = vcmask (!%p1580_p7), 261120   ;;  %v2271_v0 = vmov (!%p1580_p7), 0.0  }
  0x56   : > { %190 = sbr.rel (%p1580_p7) target bundleno = 93 (0x5d), region = 40  ;;  %192 = vst.msk [vmem:[#allocation2] sm:$0xff] (!%p1580_p7), %vm191_vm0, %v2271_v0  ;;  %193 = vst.msk [vmem:[#allocation3] sm:$0xff] (!%p1580_p7), %vm191_vm0, %v2271_v0 }
  0x5d PF: > { %v194_v1 = vld [vmem:[#allocation7] sm:$0xff]  ;;  %v195_v2 = vld [vmem:[#allocation7 + $0x8] sm:$0xff]  ;;  %v2272_v4 = vmov 0.0|0.0   ;;  %v196_v7 = vld [vmem:[#allocation7 + $0x10] sm:$0xff]  ;;  %vm2273_vm1 = vmmov 0   ;;  %v2274_v12 = vmov 0.0  }
  0x5e   : > { %v199_v3 = vld [vmem:[#allocation7 + $0x20] sm:$0xff]  ;;  %1884 = vmatprep.subr.bf16.mxu0 %v2272_v4  ;;  %1890 = vmatprep.subr.bf16.mxu1 %v2272_v4  ;;  %v2439_v5 = vpack.c.bf16 %v195_v2, %v194_v1  ;;  %v200_v6 = vld [vmem:[#allocation7 + $0x28] sm:$0xff]  ;;  %v197_v8 = vld [vmem:[#allocation7 + $0x18] sm:$0xff]  ;;  %vm219_vm2 = vcmask 261120   ;;  %p1621_p1 = scmp.ne.s32.totalorder %s2257_s12, 1 }
  0x5f   : > { %v2441_v9 = vpack.c.bf16 %v200_v6, %v199_v3  ;;  %v201_v10 = vld [vmem:[#allocation7 + $0x30] sm:$0xff]  ;;  %v202_v11 = vld [vmem:[#allocation7 + $0x38] sm:$0xff]  ;;  %1716 = vmatprep.mubr.msk.f32.mxu0 %vm2273_vm1, %v2274_v12  ;;  %1727 = vmatprep.mubr.msk.f32.mxu1 %vm2273_vm1, %v2274_v12  ;;  %v2448_v13 = vpack.c.bf16 %v197_v8, %v196_v7  ;;  %v204_v15 = vld [vmem:[#allocation7 + $0x40] sm:$0xff] }
  0x60   : > { %1886 = vmatpush3.bf16.msra.mxu0 %v2439_v5  ;;  %v2452_v14 = vpack.c.bf16 %v202_v11, %v201_v10  ;;  %v205_v16 = vld [vmem:[#allocation7 + $0x48] sm:$0xff]  ;;  %v209_v17 = vld [vmem:[#allocation7 + $0x60] sm:$0xff]  ;;  %v213_v19 = vld [vmem:[#allocation2] sm:$0xff] }
  0x61   : > { %1892 = vmatpush3.bf16.msra.mxu1 %v2441_v9  ;;  %1887 = vmatprep.subr.bf16.mxu0 %v2272_v4  ;;  %v210_v18 = vld [vmem:[#allocation7 + $0x68] sm:$0xff]  ;;  %v2456_v20 = vpack.c.bf16 %v205_v16, %v204_v15  ;;  %v206_v22 = vld [vmem:[#allocation7 + $0x50] sm:$0xff]  ;;  %v207_v23 = vld [vmem:[#allocation7 + $0x58] sm:$0xff] }
  0x62   : > { %1893 = vmatprep.subr.bf16.mxu1 %v2272_v4  ;;  %v2460_v21 = vpack.c.bf16 %v210_v18, %v209_v17  ;;  %v211_v24 = vld [vmem:[#allocation7 + $0x70] sm:$0xff]  ;;  %v212_v25 = vld [vmem:[#allocation7 + $0x78] sm:$0xff]  ;;  %v2466_v26 = vpack.c.bf16 %v207_v23, %v206_v22  ;;  %v215_v28 = vld [vmem:[%s2426_s6] sm:$0xff] }
  0x63   : > { %v2470_v27 = vpack.c.bf16 %v212_v25, %v211_v24  ;;  %v216_v29 = vld [vmem:[%s2426_s6 + $0x8] sm:$0xff]  ;;  %v218_v38 = vld [vmem:[%s2426_s6 + $0x18] sm:$0xff]  ;;  %v217_v40 = vld [vmem:[%s2426_s6 + $0x10] sm:$0xff] }
  0x64   : > { %1889 = vmatpush3.bf16.msra.mxu0 %v2448_v13  ;;  %v214_v53 = vld [vmem:[#allocation3] sm:$0xff]  ;;  %v1588_v63 = vld [vmem:[%s2426_s6 + $0x20] sm:$0xff]  ;;  %v1589_v0 = vld [vmem:[%s2426_s6 + $0x28] sm:$0xff] }
  0x65   : > { %1895 = vmatpush3.bf16.msra.mxu1 %v2452_v14  ;;  %1896 = vmatprep.subr.bf16.mxu0 %v2272_v4  ;;  %v1591_v15 = vld [vmem:[%s2426_s6 + $0x38] sm:$0xff]  ;;  %v1590_v23 = vld [vmem:[%s2426_s6 + $0x30] sm:$0xff] }
  0x66   : > { %1902 = vmatprep.subr.bf16.mxu1 %v2272_v4 }
  0x67   : > { %1717 = vmatmul.mubr.msk.f32.vlgmr.msra.gmra.mrb[0].mxu0 %vm219_vm2, %v213_v19 }
  0x68   : > { %1728 = vmatmul.mubr.msk.f32.vlgmr.msra.gmra.mrb[0].mxu1 %vm219_vm2, %v213_v19  ;;  %1898 = vmatpush3.bf16.msra.mxu0 %v2456_v20 }
  0x69   : > { %1904 = vmatpush3.bf16.msra.mxu1 %v2460_v21  ;;  %1899 = vmatprep.subr.bf16.mxu0 %v2272_v4 }
  0x6a   : > { %1905 = vmatprep.subr.bf16.mxu1 %v2272_v4  ;;  %1738 = vmatprep.mubr.msk.f32.mxu0 %vm2273_vm1, %v2274_v12 }
  0x6b   : > { %1749 = vmatprep.mubr.msk.f32.mxu1 %vm2273_vm1, %v2274_v12 }
  0x6c   : > { %1901 = vmatpush3.bf16.msra.mxu0 %v2466_v26 }
  0x6d   : > { %1907 = vmatpush3.bf16.msra.mxu1 %v2470_v27  ;;  %1908 = vmatprep.subr.bf16.mxu0 %v2272_v4 }
  0x6e   : > { %1914 = vmatprep.subr.bf16.mxu1 %v2272_v4 }
  0x6f   : > { %1739 = vmatmul.mubr.msk.f32.vlgmr.msra.gmra.mrb[2].mxu0 %vm219_vm2, %v213_v19 }
  0x70   : > { %1750 = vmatmul.mubr.msk.f32.vlgmr.msra.gmra.mrb[2].mxu1 %vm219_vm2, %v213_v19  ;;  %1910 = vmatpush3.bf16.msra.mxu0 %v2439_v5 }
  0x71   : > { %1916 = vmatpush3.bf16.msra.mxu1 %v2441_v9  ;;  %1911 = vmatprep.subr.bf16.mxu0 %v2272_v4 }
  0x72   : > { %1917 = vmatprep.subr.bf16.mxu1 %v2272_v4  ;;  %1760 = vmatprep.mubr.msk.f32.mxu0 %vm2273_vm1, %v2274_v12 }
  0x73   : > { %1771 = vmatprep.mubr.msk.f32.mxu1 %vm2273_vm1, %v2274_v12 }
  0x74   : > { %1913 = vmatpush3.bf16.msra.mxu0 %v2448_v13 }
  0x75   : > { %1919 = vmatpush3.bf16.msra.mxu1 %v2452_v14  ;;  %1920 = vmatprep.subr.bf16.mxu0 %v2272_v4 }
  0x76   : > { %1926 = vmatprep.subr.bf16.mxu1 %v2272_v4 }
 0x13a   : > { %v289_v30 = vpop.f32.mrb[0].mxu0 }
 0x13b   : > { %v293_v31 = vadd.f32 %v289_v30, %v215_v28  ;;  %v366_v32 = vpop.f32.mrb[0].mxu1  ;;  %v1718_v33 = vpop.f32.mrb[1].mxu0 }
 0x13c   : > { %v370_v34 = vadd.f32 %v366_v32, %v216_v29  ;;  %v1729_v35 = vpop.f32.mrb[1].mxu1 }
 0x13d   : > { %v1582_v36 = vmul.f32 -1.442695, %v293_v31 }
 0x13e   : > { %v1584_v37 = vmul.f32 -1.442695, %v370_v34 }
 0x13f   : > { %2059 = vpow2.f32 %v1582_v36 }
 0x140   : > { %2061 = vpow2.f32 %v1584_v37 }
 0x142   : > { %v444_v39 = vpop.f32.mrb[2].mxu0 }
 0x143   : > { %v518_v41 = vpop.f32.mrb[2].mxu1  ;;  %v1740_v42 = vpop.f32.mrb[3].mxu0  ;;  %v448_v45 = vadd.f32 %v444_v39, %v217_v40 }
 0x144   : > { %v522_v43 = vadd.f32 %v518_v41, %v218_v38  ;;  %v1751_v44 = vpop.f32.mrb[3].mxu1 }
 0x146   : > { %v1587_v46 = vmul.f32 -1.442695, %v522_v43 }
 0x148   : > { %2063 = vpow2.f32 %v1587_v46 }
 0x149   : > { %v2060_v47 = vpop.eup %2059  ;;  %2065 = vtanh.f32 %v448_v45 }
 0x14a   : > { %v2062_v48 = vpop.eup %2061  ;;  %v297_v49 = vadd.f32 1.0, %v2060_v47 }
 0x14b   : > { %v374_v50 = vadd.f32 1.0, %v2062_v48 }
 0x14c   : > { %2067 = vrcp.f32 %v297_v49 }
 0x14d   : > { %2069 = vrcp.f32 %v374_v50 }
 0x152   : > { %v2064_v51 = vpop.eup %2063 }
 0x153   : > { %v2066_v52 = vpop.eup %2065  ;;  %v526_v55 = vadd.f32 1.0, %v2064_v51 }
 0x155   : > { %2071 = vrcp.f32 %v526_v55  ;;  %v1601_v55 = vld [vmem:[%s2426_s6 + $0x50] sm:$0xff] }
 0x156   : > { %v2068_v54 = vpop.eup %2067 }
 0x157   : > { %v2070_v56 = vpop.eup %2069  ;;  %v450_v57 = vmul.f32 %v2068_v54, %v2066_v52 }
 0x158   : > { %v377_v58 = vmul.f32 %v2070_v56, %v214_v53 }
 0x15a   : > { %v2499_v59 = vadd.f32 %v450_v57, %v377_v58 }
 0x15c   : > { %2073 = vtanh.f32 %v2499_v59 }
 0x15f   : > { %v2072_v60 = vpop.eup %2071 }
 0x166   : > { %v2074_v61 = vpop.eup %2073 }
 0x167   : > { %v530_v62 = vmul.f32 %v2074_v61, %v2072_v60 }
 0x169   : > { %1761 = vmatmul.mubr.msk.f32.vlgmr.msra.gmra.mrb[4].mxu0 %vm219_vm2, %v530_v62  ;;  %1772 = vmatmul.mubr.msk.f32.vlgmr.msra.gmra.mrb[4].mxu1 %vm219_vm2, %v530_v62 }
 0x16a   : > { %1922 = vmatpush3.bf16.msra.mxu0 %v2456_v20  ;;  %1928 = vmatpush3.bf16.msra.mxu1 %v2460_v21 }
 0x16b   : > { %1923 = vmatprep.subr.bf16.mxu0 %v2272_v4  ;;  %1929 = vmatprep.subr.bf16.mxu1 %v2272_v4 }
 0x16c   : > { %1782 = vmatprep.mubr.msk.f32.mxu0 %vm2273_vm1, %v2274_v12  ;;  %1793 = vmatprep.mubr.msk.f32.mxu1 %vm2273_vm1, %v2274_v12 }
 0x16e   : > { %1925 = vmatpush3.bf16.msra.mxu0 %v2466_v26  ;;  %1931 = vmatpush3.bf16.msra.mxu1 %v2470_v27 }
 0x16f   : > { %1932 = vmatprep.subr.bf16.mxu0 %v2272_v4  ;;  %1938 = vmatprep.subr.bf16.mxu1 %v2272_v4 }
 0x171   : > { %1783 = vmatmul.mubr.msk.f32.vlgmr.msra.gmra.mrb[6].mxu0 %vm219_vm2, %v530_v62  ;;  %1794 = vmatmul.mubr.msk.f32.vlgmr.msra.gmra.mrb[6].mxu1 %vm219_vm2, %v530_v62 }
 0x172   : > { %1934 = vmatpush3.bf16.msra.mxu0 %v2439_v5  ;;  %1940 = vmatpush3.bf16.msra.mxu1 %v2441_v9 }
 0x173   : > { %1935 = vmatprep.subr.bf16.mxu0 %v2272_v4  ;;  %1941 = vmatprep.subr.bf16.mxu1 %v2272_v4 }
 0x174   : > { %1804 = vmatprep.mubr.msk.f32.mxu0 %vm2273_vm1, %v2274_v12  ;;  %1815 = vmatprep.mubr.msk.f32.mxu1 %vm2273_vm1, %v2274_v12 }
 0x176   : > { %1937 = vmatpush3.bf16.msra.mxu0 %v2448_v13  ;;  %1943 = vmatpush3.bf16.msra.mxu1 %v2452_v14 }
 0x177   : > { %1944 = vmatprep.subr.bf16.mxu0 %v2272_v4  ;;  %1950 = vmatprep.subr.bf16.mxu1 %v2272_v4 }
 0x23c   : > { %v605_v1 = vpop.f32.mrb[4].mxu0  ;;  %v682_v2 = vpop.f32.mrb[4].mxu1 }
 0x23d   : > { %v609_v3 = vadd.f32 %v1588_v63, %v605_v1  ;;  %v686_v6 = vadd.f32 %v1589_v0, %v682_v2  ;;  %v1762_v7 = vpop.f32.mrb[5].mxu0  ;;  %v1773_v8 = vpop.f32.mrb[5].mxu1 }
 0x23f   : > { %v1593_v10 = vmul.f32 -1.442695, %v609_v3  ;;  %v1595_v11 = vmul.f32 -1.442695, %v686_v6 }
 0x241   : > { %2075 = vpow2.f32 %v1593_v10 }
 0x242   : > { %2077 = vpow2.f32 %v1595_v11 }
 0x244   : > { %v760_v16 = vpop.f32.mrb[6].mxu0  ;;  %v834_v17 = vpop.f32.mrb[6].mxu1 }
 0x245   : > { %v838_v18 = vadd.f32 %v1591_v15, %v834_v17  ;;  %v1784_v19 = vpop.f32.mrb[7].mxu0  ;;  %v1795_v22 = vpop.f32.mrb[7].mxu1  ;;  %v764_v25 = vadd.f32 %v1590_v23, %v760_v16 }
 0x247   : > { %v1598_v24 = vmul.f32 -1.442695, %v838_v18 }
 0x249   : > { %2079 = vpow2.f32 %v1598_v24 }
 0x24a   : > { %2081 = vtanh.f32 %v764_v25 }
 0x24b   : > { %v2076_v28 = vpop.eup %2075 }
 0x24c   : > { %v2078_v29 = vpop.eup %2077  ;;  %v613_v30 = vadd.f32 1.0, %v2076_v28 }
 0x24d   : > { %v690_v31 = vadd.f32 1.0, %v2078_v29  ;;  %v1612_v29 = vld [vmem:[%s2426_s6 + $0x70] sm:$0xff] }
 0x24e   : > { %2083 = vrcp.f32 %v613_v30 }
 0x24f   : > { %2085 = vrcp.f32 %v690_v31 }
 0x253   : > { %v2080_v32 = vpop.eup %2079 }
 0x254   : > { %v2082_v33 = vpop.eup %2081  ;;  %v842_v37 = vadd.f32 1.0, %v2080_v32 }
 0x256   : > { %2087 = vrcp.f32 %v842_v37 }
 0x258   : > { %v2084_v34 = vpop.eup %2083 }
 0x259   : > { %v2086_v35 = vpop.eup %2085  ;;  %v766_v36 = vmul.f32 %v2084_v34, %v2082_v33 }
 0x25a   : > { %v693_v38 = vmul.f32 %v2086_v35, %v2499_v59 }
 0x25c   : > { %v2535_v39 = vadd.f32 %v766_v36, %v693_v38 }
 0x25e   : > { %2089 = vtanh.f32 %v2535_v39 }
 0x260   : > { %v2088_v40 = vpop.eup %2087 }
 0x268   : > { %v2090_v41 = vpop.eup %2089 }
 0x269   : > { %v846_v42 = vmul.f32 %v2090_v41, %v2088_v40 }
 0x26b   : > { %1805 = vmatmul.mubr.msk.f32.vlgmr.msra.gmra.mrb[8].mxu0 %vm219_vm2, %v846_v42  ;;  %1816 = vmatmul.mubr.msk.f32.vlgmr.msra.gmra.mrb[8].mxu1 %vm219_vm2, %v846_v42 }
 0x26c   : > { %1946 = vmatpush3.bf16.msra.mxu0 %v2456_v20  ;;  %1952 = vmatpush3.bf16.msra.mxu1 %v2460_v21 }
 0x26d   : > { %1947 = vmatprep.subr.bf16.mxu0 %v2272_v4  ;;  %1953 = vmatprep.subr.bf16.mxu1 %v2272_v4 }
 0x26e   : > { %1826 = vmatprep.mubr.msk.f32.mxu0 %vm2273_vm1, %v2274_v12  ;;  %1837 = vmatprep.mubr.msk.f32.mxu1 %vm2273_vm1, %v2274_v12 }
 0x270   : > { %1949 = vmatpush3.bf16.msra.mxu0 %v2466_v26  ;;  %1955 = vmatpush3.bf16.msra.mxu1 %v2470_v27 }
 0x271   : > { %1956 = vmatprep.subr.bf16.mxu0 %v2272_v4  ;;  %1962 = vmatprep.subr.bf16.mxu1 %v2272_v4 }
 0x273   : > { %1827 = vmatmul.mubr.msk.f32.vlgmr.msra.gmra.mrb[10].mxu0 %vm219_vm2, %v846_v42  ;;  %1838 = vmatmul.mubr.msk.f32.vlgmr.msra.gmra.mrb[10].mxu1 %vm219_vm2, %v846_v42 }
 0x274   : > { %1958 = vmatpush3.bf16.msra.mxu0 %v2439_v5  ;;  %1964 = vmatpush3.bf16.msra.mxu1 %v2441_v9  ;;  %v1599_v5 = vld [vmem:[%s2426_s6 + $0x40] sm:$0xff]  ;;  %v1600_v9 = vld [vmem:[%s2426_s6 + $0x48] sm:$0xff] }
 0x275   : > { %1959 = vmatprep.subr.bf16.mxu0 %v2272_v4  ;;  %1965 = vmatprep.subr.bf16.mxu1 %v2272_v4 }
 0x276   : > { %1848 = vmatprep.mubr.msk.f32.mxu0 %vm2273_vm1, %v2274_v12  ;;  %1859 = vmatprep.mubr.msk.f32.mxu1 %vm2273_vm1, %v2274_v12 }
 0x278   : > { %1961 = vmatpush3.bf16.msra.mxu0 %v2448_v13  ;;  %1967 = vmatpush3.bf16.msra.mxu1 %v2452_v14  ;;  %v1602_v13 = vld [vmem:[%s2426_s6 + $0x58] sm:$0xff] }
 0x279   : > { %1968 = vmatprep.subr.bf16.mxu0 %v2272_v4  ;;  %1974 = vmatprep.subr.bf16.mxu1 %v2272_v4 }
 0x33e   : > { %v921_v43 = vpop.f32.mrb[8].mxu0  ;;  %v998_v44 = vpop.f32.mrb[8].mxu1 }
 0x33f   : > { %v925_v45 = vadd.f32 %v1599_v5, %v921_v43  ;;  %v1002_v46 = vadd.f32 %v1600_v9, %v998_v44  ;;  %v1806_v47 = vpop.f32.mrb[9].mxu0  ;;  %v1817_v48 = vpop.f32.mrb[9].mxu1 }
 0x341   : > { %v1604_v49 = vmul.f32 -1.442695, %v925_v45  ;;  %v1606_v50 = vmul.f32 -1.442695, %v1002_v46 }
 0x343   : > { %2091 = vpow2.f32 %v1604_v49 }
 0x344   : > { %2093 = vpow2.f32 %v1606_v50 }
 0x346   : > { %v1076_v51 = vpop.f32.mrb[10].mxu0  ;;  %v1150_v14 = vpop.f32.mrb[10].mxu1 }
 0x347   : > { %v1154_v52 = vadd.f32 %v1602_v13, %v1150_v14  ;;  %v1828_v53 = vpop.f32.mrb[11].mxu0  ;;  %v1839_v54 = vpop.f32.mrb[11].mxu1  ;;  %v1080_v57 = vadd.f32 %v1601_v55, %v1076_v51 }
 0x349   : > { %v1609_v56 = vmul.f32 -1.442695, %v1154_v52 }
 0x34b   : > { %2095 = vpow2.f32 %v1609_v56 }
 0x34c   : > { %2097 = vtanh.f32 %v1080_v57 }
 0x34d   : > { %v2092_v58 = vpop.eup %2091 }
 0x34e   : > { %v2094_v59 = vpop.eup %2093  ;;  %v929_v60 = vadd.f32 1.0, %v2092_v58 }
 0x34f   : > { %v1006_v61 = vadd.f32 1.0, %v2094_v59 }
 0x350   : > { %2099 = vrcp.f32 %v929_v60 }
 0x351   : > { %2101 = vrcp.f32 %v1006_v61 }
 0x355   : > { %v2096_v62 = vpop.eup %2095 }
 0x356   : > { %v2098_v63 = vpop.eup %2097  ;;  %v1158_v3 = vadd.f32 1.0, %v2096_v62 }
 0x358   : > { %2103 = vrcp.f32 %v1158_v3 }
 0x35a   : > { %v2100_v0 = vpop.eup %2099 }
 0x35b   : > { %v2102_v1 = vpop.eup %2101  ;;  %v1082_v2 = vmul.f32 %v2100_v0, %v2098_v63 }
 0x35c   : > { %v1009_v6 = vmul.f32 %v2102_v1, %v2535_v39 }
 0x35e   : > { %v1083_v7 = vadd.f32 %v1082_v2, %v1009_v6 }
 0x360   : > { %2105 = vtanh.f32 %v1083_v7 }
 0x362   : > { %v2104_v8 = vpop.eup %2103 }
 0x36a   : > { %v2106_v10 = vpop.eup %2105 }
 0x36b   : > { %v1162_v11 = vmul.f32 %v2106_v10, %v2104_v8 }
 0x36d   : > { %1849 = vmatmul.mubr.msk.f32.vlgmr.msra.gmra.mrb[12].mxu0 %vm219_vm2, %v1162_v11  ;;  %1860 = vmatmul.mubr.msk.f32.vlgmr.msra.gmra.mrb[12].mxu1 %vm219_vm2, %v1162_v11 }
 0x36e   : > { %1970 = vmatpush3.bf16.msra.mxu0 %v2456_v20  ;;  %1976 = vmatpush3.bf16.msra.mxu1 %v2460_v21  ;;  %v1610_v20 = vld [vmem:[%s2426_s6 + $0x60] sm:$0xff]  ;;  %v1611_v21 = vld [vmem:[%s2426_s6 + $0x68] sm:$0xff] }
 0x36f   : > { %1971 = vmatprep.subr.bf16.mxu0 %v2272_v4  ;;  %1977 = vmatprep.subr.bf16.mxu1 %v2272_v4 }
 0x370   : > { %1870 = vmatprep.mubr.msk.f32.mxu0 %vm2273_vm1, %v2274_v12  ;;  %1881 = vmatprep.mubr.msk.f32.mxu1 %vm2273_vm1, %v2274_v12 }
 0x372   : > { %1973 = vmatpush3.bf16.msra.mxu0 %v2466_v26  ;;  %1979 = vmatpush3.bf16.msra.mxu1 %v2470_v27  ;;  %v1613_v26 = vld [vmem:[%s2426_s6 + $0x78] sm:$0xff] }
 0x375   : > { %1871 = vmatmul.mubr.msk.f32.vlgmr.msra.gmra.mrb[14].mxu0 %vm219_vm2, %v1162_v11  ;;  %1882 = vmatmul.mubr.msk.f32.vlgmr.msra.gmra.mrb[14].mxu1 %vm219_vm2, %v1162_v11 }
 0x440   : > { %v1237_v15 = vpop.f32.mrb[12].mxu0  ;;  %v1314_v4 = vpop.f32.mrb[12].mxu1 }
 0x441   : > { %v1241_v16 = vadd.f32 %v1610_v20, %v1237_v15  ;;  %v1318_v17 = vadd.f32 %v1611_v21, %v1314_v4  ;;  %v1850_v18 = vpop.f32.mrb[13].mxu0  ;;  %v1861_v19 = vpop.f32.mrb[13].mxu1 }
 0x443   : > { %v1615_v22 = vmul.f32 -1.442695, %v1241_v16  ;;  %v1617_v12 = vmul.f32 -1.442695, %v1318_v17 }
 0x445   : > { %2107 = vpow2.f32 %v1615_v22 }
 0x446   : > { %2109 = vpow2.f32 %v1617_v12 }
 0x448   : > { %v1392_v23 = vpop.f32.mrb[14].mxu0  ;;  %v1466_v27 = vpop.f32.mrb[14].mxu1 }
 0x449   : > { %v1470_v24 = vadd.f32 %v1613_v26, %v1466_v27  ;;  %v1872_v25 = vpop.f32.mrb[15].mxu0  ;;  %v1883_v28 = vpop.f32.mrb[15].mxu1  ;;  %v1396_v31 = vadd.f32 %v1612_v29, %v1392_v23 }
 0x44b   : > { %v1620_v30 = vmul.f32 -1.442695, %v1470_v24 }
 0x44d   : > { %2111 = vpow2.f32 %v1620_v30 }
 0x44e   : > { %2113 = vtanh.f32 %v1396_v31 }
 0x44f   : > { %v2108_v32 = vpop.eup %2107 }
 0x450   : > { %v2110_v33 = vpop.eup %2109  ;;  %v1245_v34 = vadd.f32 1.0, %v2108_v32 }
 0x451   : > { %v1322_v35 = vadd.f32 1.0, %v2110_v33 }
 0x452   : > { %2115 = vrcp.f32 %v1245_v34 }
 0x453   : > { %2117 = vrcp.f32 %v1322_v35 }
 0x457   : > { %v2112_v36 = vpop.eup %2111 }
 0x458   : > { %v2114_v37 = vpop.eup %2113  ;;  %v1474_v41 = vadd.f32 1.0, %v2112_v36 }
 0x45a   : > { %2119 = vrcp.f32 %v1474_v41 }
 0x45c   : > { %v2116_v38 = vpop.eup %2115 }
 0x45d   : > { %v2118_v39 = vpop.eup %2117  ;;  %v1398_v40 = vmul.f32 %v2116_v38, %v2114_v37 }
 0x45e   : > { %v1325_v42 = vmul.f32 %v2118_v39, %v1083_v7 }
 0x460   : > { %v1399_v5 = vadd.f32 %v1398_v40, %v1325_v42 }
 0x462   : > { %2121 = vtanh.f32 %v1399_v5  ;;  %1480 = vst.msk [vmem:[#allocation3] sm:$0xff] %vm219_vm2, %v1399_v5 }
 0x464   : > { %v2120_v9 = vpop.eup %2119 }
 0x469   : > { %1484 = sbr.rel (%p1621_p1) target bundleno = 1144 (0x478), region = 44 }
 0x46c   : > { %v2122_v43 = vpop.eup %2121 }
 0x46d   : > { %v1478_v44 = vmul.f32 %v2122_v43, %v2120_v9 }
 0x46f   : > { %1479 = vst.msk [vmem:[#allocation2] sm:$0xff] %vm219_vm2, %v1478_v44 }
 0x476   : > { %v1485_v45 = vld [vmem:[#allocation2] sm:$0xff] }
 0x477   : > { %1486 = vst.msk [vmem:[#allocation9] sm:$0xff] %vm219_vm2, %v1485_v45 }
 0x478 PF: > { %p2595_p4 = scmp.eq.s32.totalorder %s1569_s15, 1  ;;  %s2275_s17 = smov [#allocation9]  }
 0x479   : > { %s1496_s18 = sshll.u32 %s2275_s17, 4  ;;  %s1497_s18 = int_to_ptr.vmem [resolvable:$true] %s1496_s18 }
 0x47a   : > { %s2181_s3 = scalar_lea.vmem %s1497_s18, 128  ;;  %p2188_p10 = scmp.lt.s32.totalorder %s1497_s18, %s1497_s18 }
 0x47b   : > { %p2182_p5 = scmp.ne.s32.totalorder %s1497_s18, %s2181_s3  ;;  %p2189_p11 = scmp.lt.s32.totalorder %s2181_s3, %s2181_s3 }
 0x47d   : > { %p2183_p8 = pnand %p2182_p5, %p2595_p4  ;;  %p2190_p13 = por %p2189_p11, %p2188_p10 }
 0x47f   : > { %p2184_p9 = pneg %p2183_p8 }
 0x481   : > { %p2191_p2 = pnand %p2190_p13, %p2184_p9 }
 0x483   : > { %2194 = shalt.err (!%p2191_p2)
}
 0x484   : > { %s2195_s15 = scalar_lea.hbm %s2641_s2, 128 }
 0x485   : > { %p2196_p3 = scmp.ne.s32.totalorder %s2641_s2, %s2195_s15  ;;  %p2201_p6 = scmp.lt.u32.totalorder %s2195_s15, %s2641_s2 }
 0x487   : > { %p2197_p12 = pnand %p2196_p3, %p2595_p4 }
 0x489   : > { %p2198_p0 = pneg %p2197_p12 }
 0x48b   : > { %p2203_p7 = pnand %p2201_p6, %p2198_p0 }
 0x48d   : > { %2206 = shalt.err (!%p2203_p7)
}
 0x48e   : > { %1987 = dma.vmem_to_hbm [thread:$0]  (%p2595_p4), %s1497_s18, 128, %s2641_s2, [#allocation6]  }
 0x48f   : > { %2240 = dma.done.wait (%p2595_p4), [#allocation6], 128  }
 0x490   : > { %2242 = vsyncadd (%p2595_p4), [#allocation6], 4294967168 }
 0x491 PF: > { %s17_s14 = sadd.s32 1, %s2265_s14   ;;  %s2655_s9 = smov %s2249_s10 }
 0x492   : > { %p14_p1 = scmp.ge.s32.totalorder %s17_s14, 4   ;;  %s2656_s10 = smov %s2253_s11 }
 0x493   : > { %s2657_s11 = smov %s2379_s23  ;;  %s2658_s12 = smov %s2261_s13 }
 0x494   : > { %s2659_s13 = smov %s2661_s22  ;;  %16 = sbr.rel (!%p14_p1) target bundleno = 6 (0x6), region = 84 }
 0x49b   :  { %1509 = vsyncpa [#allocation5], 1 }
 0x49c   :  { %1511 = vsyncpa [#allocation5 + $0x1], 1 }
 0x49d   :  { %1512 = vsyncpa [#allocation8], 1 }
 0x49e   :  { %1513 = vsyncpa [#allocation6], 1 }
 0x49f   :  { %1515 = vsyncpa [#allocation6 + $0x1], 1 }

// kernel: tpu_custom_call.1
= control target key start
LH: loop header
LB: loop body
LE: loop exit
PB: predicated region body
PF: predicated region fallthrough
CT: control target
= control target key end

     0   :  { %7 = vsyncpa [#allocation5], 0  ;;  %s2639_s0 = inlined_call_operand.hbm [shape: f32[8,4,8,32], index: 0, kind: input, shape index: {}]   ;;  %s2640_s1 = inlined_call_operand.hbm [shape: f32[4,32,32], index: 1, kind: input, shape index: {}]   ;;  %s2641_s2 = inlined_call_operand.hbm [shape: f32[8,32], index: 2, kind: output, shape index: {}]  }
   0x1   :  { %9 = vsyncpa [#allocation5 + $0x1], 0 }
   0x2   :  { %10 = vsyncpa [#allocation8], 0 }
   0x3   :  { %11 = vsyncpa [#allocation6], 0  ;;  %s2291_s9 = smov 0   ;;  %s2293_s10 = smov 0  }
   0x4   :  { %s2295_s11 = smov 0   ;;  %s2297_s12 = smov 0  }
   0x5   :  { %s2299_s13 = smov 0   ;;  %s2301_s14 = smov 0  }
   0x6 LB: > { %s1569_s15 = sadd.s32 4294967295, %s2265_s14   ;;  %p51_p0 = scmp.ne.s32.totalorder %s2249_s10, %s2245_s9  ;;  %s2265_s14 = sphi %s2301_s14, %s17_s14   ;;  %s2261_s13 = sphi %s2299_s13, %s2659_s13   ;;  %s2257_s12 = sphi %s2297_s12, %s2658_s12   ;;  %s2253_s11 = sphi %s2295_s11, %s2657_s11   ;;  %s2249_s10 = sphi %s2293_s10, %s2656_s10   ;;  %s2245_s9 = sphi %s2291_s9, %s2655_s9  }
   0x7   : > { %p2323_p1 = scmp.eq.s32.totalorder %s1569_s15, 0  ;;  %p1570_p2 = scmp.ge.s32.totalorder %s2265_s14, 1 }
   0x8   : > { %p109_p3 = scmp.lt.s32.totalorder %s2265_s14, 3  ;;  %s2267_s19 = smov [#allocation7]  }
   0x9   : > { %s2646_s16 = scalar_select %p2323_p1, 1, 0 }
   0xa   : > { %p2331_p4 = por %p2323_p1, %p51_p0  ;;  %p2335_p5 = pnand %p1570_p2, %p109_p3 }
   0xb   : > { %s121_s20 = sshll.u32 %s2267_s19, 4  ;;  %s26_s22 = sadd.s32 1, %s2261_s13  ;;  %s122_s20 = int_to_ptr.vmem [resolvable:$true] %s121_s20 }
   0xc   : > { %s2647_s17 = scalar_select %p2331_p4, 1, 0 }
   0xd   : > { %s2648_s18 = scalar_select %p2335_p5, 1, 0 }
   0xe   : > { %p1990_p6 = pneg %p2335_p5  ;;  %s2123_s25 = scalar_lea.hbm %s2640_s1, 2048 }
   0xf   : > { %p2124_p8 = scmp.ne.s32.totalorder %s2640_s1, %s2123_s25  ;;  %p2130_p12 = scmp.lt.u32.totalorder %s2123_s25, %s2640_s1 }
  0x10   : > { %p2343_p7 = pnand %p1990_p6, %p2323_p1 }
  0x12   : > { %p2125_p9 = pneg %p2343_p7 }
  0x14   : > { %p2126_p10 = pnand %p2125_p9, %p2124_p8 }
  0x16   : > { %p2127_p11 = pneg %p2126_p10 }
  0x18   : > { %p2132_p13 = pnand %p2130_p12, %p2127_p11 }
  0x1a   : > { %2135 = shalt.err (!%p2132_p13)
}
  0x1b   : > { %s2136_s30 = scalar_lea.vmem %s122_s20, 2048  ;;  %p2144_p6 = scmp.lt.s32.totalorder %s122_s20, %s122_s20 }
  0x1c   : > { %p2137_p0 = scmp.ne.s32.totalorder %s122_s20, %s2136_s30  ;;  %p2145_p1 = scmp.lt.s32.totalorder %s2136_s30, %s2136_s30 }
  0x1e   : > { %p2139_p2 = pnand %p2137_p0, %p2125_p9  ;;  %p2146_p4 = por %p2145_p1, %p2144_p6 }
  0x20   : > { %p2140_p3 = pneg %p2139_p2 }
  0x22   : > { %p2147_p5 = pnand %p2146_p4, %p2140_p3 }
  0x24   : > { %2150 = shalt.err (!%p2147_p5)
}
  0x25   : > { %s2268_s3 = smov 128   ;;  %s2269_s4 = smov 8  }
  0x26   : > { %1993 = dma.hbm_to_vmem [thread:$0]  (!%p2343_p7), %s2640_s1, 2048, %s122_s20, [#allocation8], %s2268_s3, %s2268_s3, %s2269_s4  }
  0x27   : > { %p27_p1 = scmp.ge.s32.totalorder %s26_s22, 2  ;;  %s38_s7 = sadd.s32 1, %s2253_s11 }
  0x28   : > { %p45_p4 = scmp.ne.s32.totalorder %s2253_s11, %s2249_s10  ;;  %p46_p5 = scmp.eq.s32.totalorder %s2265_s14, 0 }
  0x29   : > { %s2661_s22 = smov (%p27_p1, %s26_s22), 0  ;;  %p1999_p9 = scmp.lt.s32.totalorder %s2265_s14, 2 }
  0x2a   : > { %p47_p8 = por %p46_p5, %p45_p4  ;;  %s33_s8 = ssub.s32 %s2261_s13, %s2661_s22 }
  0x2b   : > { %s135_s9 = sand.u32 1, %s2253_s11   ;;  %p36_p10 = scmp.eq.s32.totalorder %s33_s8, 0 }
  0x2c   : > { %s1573_s19 = sshll.u32 %s135_s9, 7  ;;  %s1627_s21 = sshll.u32 %s2261_s13, 11 }
  0x2d   : > { %s2379_s23 = scalar_select %p36_p10, %s2253_s11, %s38_s7  }
  0x2e   : > { %s2384_s20 = scalar_lea.hbm %s2639_s0, %s1627_s21  ;;  %s139_s26 = scalar_lea.vmem [#allocation4], %s1573_s19 }
  0x2f   : > { %s148_s27 = sshll.u32 %s139_s26, 4  ;;  %p2386_p7 = pnand %p1999_p9, %p47_p8  ;;  %s2390_s27 = int_to_ptr.vmem [resolvable:$true] %s148_s27 }
  0x30   : > { %s2392_s29 = scalar_lea.sflag [#allocation5], %s135_s9  ;;  %s2151_s30 = scalar_lea.hbm %s2384_s20, 2048 }
  0x31   : > { %p2152_p11 = scmp.ne.s32.totalorder %s2384_s20, %s2151_s30  ;;  %p2153_p12 = pneg %p2386_p7 }
  0x32   : > { %s2156_s7 = scalar_lea.hbm %s2639_s0, 4096  ;;  %p2157_p2 = scmp.lt.u32.totalorder %s2384_s20, %s2639_s0 }
  0x33   : > { %p2154_p13 = pnand %p2153_p12, %p2152_p11  ;;  %p2158_p3 = scmp.lt.u32.totalorder %s2156_s7, %s2151_s30 }
  0x34   : > { %p2160_p1 = scmp.lt.u32.totalorder %s2151_s30, %s2384_s20 }
  0x35   : > { %p2155_p0 = pneg %p2154_p13  ;;  %p2159_p6 = por %p2158_p3, %p2157_p2 }
  0x37   : > { %p2161_p4 = por %p2160_p1, %p2159_p6 }
  0x39   : > { %p2162_p5 = pnand %p2161_p4, %p2155_p0 }
  0x3b   : > { %2165 = shalt.err (!%p2162_p5)
}
  0x3c   : > { %s2166_s9 = scalar_lea.vmem %s2390_s27, 2048  ;;  %s2270_s21 = smov [#allocation4]  }
  0x3d   : > { %p2167_p8 = scmp.ne.s32.totalorder %s2390_s27, %s2166_s9  ;;  %s2171_s24 = sshll.u32 %s2270_s21, 4  ;;  %s2172_s24 = int_to_ptr.vmem [resolvable:$false] %s2171_s24 }
  0x3e   : > { %s2173_s25 = scalar_lea.vmem %s2172_s24, 4096  ;;  %p2174_p11 = scmp.lt.s32.totalorder %s2390_s27, %s2172_s24 }
  0x3f   : > { %p2169_p9 = pnand %p2167_p8, %p2153_p12  ;;  %p2175_p13 = scmp.lt.s32.totalorder %s2173_s25, %s2166_s9 }
  0x41   : > { %p2170_p10 = pneg %p2169_p9  ;;  %p2176_p2 = por %p2175_p13, %p2174_p11 }
  0x43   : > { %p2177_p3 = pnand %p2176_p2, %p2170_p10 }
  0x45   : > { %2180 = shalt.err (!%p2177_p3)
}
  0x46   : > { %1997 = dma.hbm_to_vmem [thread:$0]  (!%p2386_p7), %s2384_s20, 2048, %s2390_s27, %s2392_s29, %s2268_s3, %s2268_s3, %s2269_s4  }
  0x47   : > { %p2651_p12 = scmp.ne.s32.totalorder %s2648_s18, 0 }
  0x48   : > { %s162_s26 = sand.u32 (!%p2651_p12), 1, %s2249_s10   ;;  %p2652_p0 = scmp.ne.s32.totalorder (!%p2651_p12), %s2647_s17, 0 }
  0x49   : > { %160 = sbr.rel (%p2651_p12) target bundleno = 1169 (0x491), region = 28  ;;  %s1578_s30 = sshll.u32 (!%p2651_p12), %s162_s26, 7 }
  0x4a   : > { %s163_s5 = scalar_lea.sflag (!%p2651_p12), [#allocation5], %s162_s26  ;;  %s2426_s6 = scalar_lea.vmem (!%p2651_p12), [#allocation4], %s1578_s30 }
  0x50   : > { %2232 = dma.done.wait (%p2652_p0), %s163_s5, 2048  }
  0x51   : > { %2234 = vsyncadd (%p2652_p0), %s163_s5, 4294965248  ;;  %p2653_p6 = scmp.ne.s32.totalorder %s2646_s16, 0 }
  0x53   : > { %2236 = dma.done.wait (%p2653_p6), [#allocation8], 2048  }
  0x54   : > { %2238 = vsyncadd (%p2653_p6), [#allocation8], 4294965248  ;;  %p1580_p7 = scmp.ne.s32.totalorder %s2257_s12, 0 }
  0x55   : > { %vm191_vm0 = vcmask (!%p1580_p7), 261120   ;;  %v2271_v0 = vmov (!%p1580_p7), 0.0  }
  0x56   : > { %190 = sbr.rel (%p1580_p7) target bundleno = 93 (0x5d), region = 40  ;;  %192 = vst.msk [vmem:[#allocation2] sm:$0xff] (!%p1580_p7), %vm191_vm0, %v2271_v0  ;;  %193 = vst.msk [vmem:[#allocation3] sm:$0xff] (!%p1580_p7), %vm191_vm0, %v2271_v0 }
  0x5d PF: > { %v194_v1 = vld [vmem:[#allocation7] sm:$0xff]  ;;  %v195_v2 = vld [vmem:[#allocation7 + $0x8] sm:$0xff]  ;;  %v2272_v4 = vmov 0.0|0.0   ;;  %v196_v7 = vld [vmem:[#allocation7 + $0x10] sm:$0xff]  ;;  %vm2273_vm1 = vmmov 0   ;;  %v2274_v12 = vmov 0.0  }
  0x5e   : > { %v199_v3 = vld [vmem:[#allocation7 + $0x20] sm:$0xff]  ;;  %1884 = vmatprep.subr.bf16.mxu0 %v2272_v4  ;;  %1890 = vmatprep.subr.bf16.mxu1 %v2272_v4  ;;  %v2439_v5 = vpack.c.bf16 %v195_v2, %v194_v1  ;;  %v200_v6 = vld [vmem:[#allocation7 + $0x28] sm:$0xff]  ;;  %v197_v8 = vld [vmem:[#allocation7 + $0x18] sm:$0xff]  ;;  %vm219_vm2 = vcmask 261120   ;;  %p1621_p1 = scmp.ne.s32.totalorder %s2257_s12, 1 }
  0x5f   : > { %v2441_v9 = vpack.c.bf16 %v200_v6, %v199_v3  ;;  %v201_v10 = vld [vmem:[#allocation7 + $0x30] sm:$0xff]  ;;  %v202_v11 = vld [vmem:[#allocation7 + $0x38] sm:$0xff]  ;;  %1716 = vmatprep.mubr.msk.f32.mxu0 %vm2273_vm1, %v2274_v12  ;;  %1727 = vmatprep.mubr.msk.f32.mxu1 %vm2273_vm1, %v2274_v12  ;;  %v2448_v13 = vpack.c.bf16 %v197_v8, %v196_v7  ;;  %v204_v15 = vld [vmem:[#allocation7 + $0x40] sm:$0xff] }
  0x60   : > { %1886 = vmatpush3.bf16.msra.mxu0 %v2439_v5  ;;  %v2452_v14 = vpack.c.bf16 %v202_v11, %v201_v10  ;;  %v205_v16 = vld [vmem:[#allocation7 + $0x48] sm:$0xff]  ;;  %v209_v17 = vld [vmem:[#allocation7 + $0x60] sm:$0xff]  ;;  %v213_v19 = vld [vmem:[#allocation2] sm:$0xff] }
  0x61   : > { %1892 = vmatpush3.bf16.msra.mxu1 %v2441_v9  ;;  %1887 = vmatprep.subr.bf16.mxu0 %v2272_v4  ;;  %v210_v18 = vld [vmem:[#allocation7 + $0x68] sm:$0xff]  ;;  %v2456_v20 = vpack.c.bf16 %v205_v16, %v204_v15  ;;  %v206_v22 = vld [vmem:[#allocation7 + $0x50] sm:$0xff]  ;;  %v207_v23 = vld [vmem:[#allocation7 + $0x58] sm:$0xff] }
  0x62   : > { %1893 = vmatprep.subr.bf16.mxu1 %v2272_v4  ;;  %v2460_v21 = vpack.c.bf16 %v210_v18, %v209_v17  ;;  %v211_v24 = vld [vmem:[#allocation7 + $0x70] sm:$0xff]  ;;  %v212_v25 = vld [vmem:[#allocation7 + $0x78] sm:$0xff]  ;;  %v2466_v26 = vpack.c.bf16 %v207_v23, %v206_v22  ;;  %v215_v28 = vld [vmem:[%s2426_s6] sm:$0xff] }
  0x63   : > { %v2470_v27 = vpack.c.bf16 %v212_v25, %v211_v24  ;;  %v216_v29 = vld [vmem:[%s2426_s6 + $0x8] sm:$0xff]  ;;  %v218_v38 = vld [vmem:[%s2426_s6 + $0x18] sm:$0xff]  ;;  %v217_v40 = vld [vmem:[%s2426_s6 + $0x10] sm:$0xff] }
  0x64   : > { %1889 = vmatpush3.bf16.msra.mxu0 %v2448_v13  ;;  %v214_v53 = vld [vmem:[#allocation3] sm:$0xff]  ;;  %v1588_v63 = vld [vmem:[%s2426_s6 + $0x20] sm:$0xff]  ;;  %v1589_v0 = vld [vmem:[%s2426_s6 + $0x28] sm:$0xff] }
  0x65   : > { %1895 = vmatpush3.bf16.msra.mxu1 %v2452_v14  ;;  %1896 = vmatprep.subr.bf16.mxu0 %v2272_v4  ;;  %v1591_v15 = vld [vmem:[%s2426_s6 + $0x38] sm:$0xff]  ;;  %v1590_v23 = vld [vmem:[%s2426_s6 + $0x30] sm:$0xff] }
  0x66   : > { %1902 = vmatprep.subr.bf16.mxu1 %v2272_v4 }
  0x67   : > { %1717 = vmatmul.mubr.msk.f32.vlgmr.msra.gmra.mrb[0].mxu0 %vm219_vm2, %v213_v19 }
  0x68   : > { %1728 = vmatmul.mubr.msk.f32.vlgmr.msra.gmra.mrb[0].mxu1 %vm219_vm2, %v213_v19  ;;  %1898 = vmatpush3.bf16.msra.mxu0 %v2456_v20 }
  0x69   : > { %1904 = vmatpush3.bf16.msra.mxu1 %v2460_v21  ;;  %1899 = vmatprep.subr.bf16.mxu0 %v2272_v4 }
  0x6a   : > { %1905 = vmatprep.subr.bf16.mxu1 %v2272_v4  ;;  %1738 = vmatprep.mubr.msk.f32.mxu0 %vm2273_vm1, %v2274_v12 }
  0x6b   : > { %1749 = vmatprep.mubr.msk.f32.mxu1 %vm2273_vm1, %v2274_v12 }
  0x6c   : > { %1901 = vmatpush3.bf16.msra.mxu0 %v2466_v26 }
  0x6d   : > { %1907 = vmatpush3.bf16.msra.mxu1 %v2470_v27  ;;  %1908 = vmatprep.subr.bf16.mxu0 %v2272_v4 }
  0x6e   : > { %1914 = vmatprep.subr.bf16.mxu1 %v2272_v4 }
  0x6f   : > { %1739 = vmatmul.mubr.msk.f32.vlgmr.msra.gmra.mrb[2].mxu0 %vm219_vm2, %v213_v19 }
  0x70   : > { %1750 = vmatmul.mubr.msk.f32.vlgmr.msra.gmra.mrb[2].mxu1 %vm219_vm2, %v213_v19  ;;  %1910 = vmatpush3.bf16.msra.mxu0 %v2439_v5 }
  0x71   : > { %1916 = vmatpush3.bf16.msra.mxu1 %v2441_v9  ;;  %1911 = vmatprep.subr.bf16.mxu0 %v2272_v4 }
  0x72   : > { %1917 = vmatprep.subr.bf16.mxu1 %v2272_v4  ;;  %1760 = vmatprep.mubr.msk.f32.mxu0 %vm2273_vm1, %v2274_v12 }
  0x73   : > { %1771 = vmatprep.mubr.msk.f32.mxu1 %vm2273_vm1, %v2274_v12 }
  0x74   : > { %1913 = vmatpush3.bf16.msra.mxu0 %v2448_v13 }
  0x75   : > { %1919 = vmatpush3.bf16.msra.mxu1 %v2452_v14  ;;  %1920 = vmatprep.subr.bf16.mxu0 %v2272_v4 }
  0x76   : > { %1926 = vmatprep.subr.bf16.mxu1 %v2272_v4 }
 0x13a   : > { %v289_v30 = vpop.f32.mrb[0].mxu0 }
 0x13b   : > { %v293_v31 = vadd.f32 %v289_v30, %v215_v28  ;;  %v366_v32 = vpop.f32.mrb[0].mxu1  ;;  %v1718_v33 = vpop.f32.mrb[1].mxu0 }
 0x13c   : > { %v370_v34 = vadd.f32 %v366_v32, %v216_v29  ;;  %v1729_v35 = vpop.f32.mrb[1].mxu1 }
 0x13d   : > { %v1582_v36 = vmul.f32 -1.442695, %v293_v31 }
 0x13e   : > { %v1584_v37 = vmul.f32 -1.442695, %v370_v34 }
 0x13f   : > { %2059 = vpow2.f32 %v1582_v36 }
 0x140   : > { %2061 = vpow2.f32 %v1584_v37 }
 0x142   : > { %v444_v39 = vpop.f32.mrb[2].mxu0 }
 0x143   : > { %v518_v41 = vpop.f32.mrb[2].mxu1  ;;  %v1740_v42 = vpop.f32.mrb[3].mxu0  ;;  %v448_v45 = vadd.f32 %v444_v39, %v217_v40 }
 0x144   : > { %v522_v43 = vadd.f32 %v518_v41, %v218_v38  ;;  %v1751_v44 = vpop.f32.mrb[3].mxu1 }
 0x146   : > { %v1587_v46 = vmul.f32 -1.442695, %v522_v43 }
 0x148   : > { %2063 = vpow2.f32 %v1587_v46 }
 0x149   : > { %v2060_v47 = vpop.eup %2059  ;;  %2065 = vtanh.f32 %v448_v45 }
 0x14a   : > { %v2062_v48 = vpop.eup %2061  ;;  %v297_v49 = vadd.f32 1.0, %v2060_v47 }
 0x14b   : > { %v374_v50 = vadd.f32 1.0, %v2062_v48 }
 0x14c   : > { %2067 = vrcp.f32 %v297_v49 }
 0x14d   : > { %2069 = vrcp.f32 %v374_v50 }
 0x152   : > { %v2064_v51 = vpop.eup %2063 }
 0x153   : > { %v2066_v52 = vpop.eup %2065  ;;  %v526_v55 = vadd.f32 1.0, %v2064_v51 }
 0x155   : > { %2071 = vrcp.f32 %v526_v55  ;;  %v1601_v55 = vld [vmem:[%s2426_s6 + $0x50] sm:$0xff] }
 0x156   : > { %v2068_v54 = vpop.eup %2067 }
 0x157   : > { %v2070_v56 = vpop.eup %2069  ;;  %v450_v57 = vmul.f32 %v2068_v54, %v2066_v52 }
 0x158   : > { %v377_v58 = vmul.f32 %v2070_v56, %v214_v53 }
 0x15a   : > { %v2499_v59 = vadd.f32 %v450_v57, %v377_v58 }
 0x15c   : > { %2073 = vtanh.f32 %v2499_v59 }
 0x15f   : > { %v2072_v60 = vpop.eup %2071 }
 0x166   : > { %v2074_v61 = vpop.eup %2073 }
 0x167   : > { %v530_v62 = vmul.f32 %v2074_v61, %v2072_v60 }
 0x169   : > { %1761 = vmatmul.mubr.msk.f32.vlgmr.msra.gmra.mrb[4].mxu0 %vm219_vm2, %v530_v62  ;;  %1772 = vmatmul.mubr.msk.f32.vlgmr.msra.gmra.mrb[4].mxu1 %vm219_vm2, %v530_v62 }
 0x16a   : > { %1922 = vmatpush3.bf16.msra.mxu0 %v2456_v20  ;;  %1928 = vmatpush3.bf16.msra.mxu1 %v2460_v21 }
 0x16b   : > { %1923 = vmatprep.subr.bf16.mxu0 %v2272_v4  ;;  %1929 = vmatprep.subr.bf16.mxu1 %v2272_v4 }
 0x16c   : > { %1782 = vmatprep.mubr.msk.f32.mxu0 %vm2273_vm1, %v2274_v12  ;;  %1793 = vmatprep.mubr.msk.f32.mxu1 %vm2273_vm1, %v2274_v12 }
 0x16e   : > { %1925 = vmatpush3.bf16.msra.mxu0 %v2466_v26  ;;  %1931 = vmatpush3.bf16.msra.mxu1 %v2470_v27 }
 0x16f   : > { %1932 = vmatprep.subr.bf16.mxu0 %v2272_v4  ;;  %1938 = vmatprep.subr.bf16.mxu1 %v2272_v4 }
 0x171   : > { %1783 = vmatmul.mubr.msk.f32.vlgmr.msra.gmra.mrb[6].mxu0 %vm219_vm2, %v530_v62  ;;  %1794 = vmatmul.mubr.msk.f32.vlgmr.msra.gmra.mrb[6].mxu1 %vm219_vm2, %v530_v62 }
 0x172   : > { %1934 = vmatpush3.bf16.msra.mxu0 %v2439_v5  ;;  %1940 = vmatpush3.bf16.msra.mxu1 %v2441_v9 }
 0x173   : > { %1935 = vmatprep.subr.bf16.mxu0 %v2272_v4  ;;  %1941 = vmatprep.subr.bf16.mxu1 %v2272_v4 }
 0x174   : > { %1804 = vmatprep.mubr.msk.f32.mxu0 %vm2273_vm1, %v2274_v12  ;;  %1815 = vmatprep.mubr.msk.f32.mxu1 %vm2273_vm1, %v2274_v12 }
 0x176   : > { %1937 = vmatpush3.bf16.msra.mxu0 %v2448_v13  ;;  %1943 = vmatpush3.bf16.msra.mxu1 %v2452_v14 }
 0x177   : > { %1944 = vmatprep.subr.bf16.mxu0 %v2272_v4  ;;  %1950 = vmatprep.subr.bf16.mxu1 %v2272_v4 }
 0x23c   : > { %v605_v1 = vpop.f32.mrb[4].mxu0  ;;  %v682_v2 = vpop.f32.mrb[4].mxu1 }
 0x23d   : > { %v609_v3 = vadd.f32 %v1588_v63, %v605_v1  ;;  %v686_v6 = vadd.f32 %v1589_v0, %v682_v2  ;;  %v1762_v7 = vpop.f32.mrb[5].mxu0  ;;  %v1773_v8 = vpop.f32.mrb[5].mxu1 }
 0x23f   : > { %v1593_v10 = vmul.f32 -1.442695, %v609_v3  ;;  %v1595_v11 = vmul.f32 -1.442695, %v686_v6 }
 0x241   : > { %2075 = vpow2.f32 %v1593_v10 }
 0x242   : > { %2077 = vpow2.f32 %v1595_v11 }
 0x244   : > { %v760_v16 = vpop.f32.mrb[6].mxu0  ;;  %v834_v17 = vpop.f32.mrb[6].mxu1 }
 0x245   : > { %v838_v18 = vadd.f32 %v1591_v15, %v834_v17  ;;  %v1784_v19 = vpop.f32.mrb[7].mxu0  ;;  %v1795_v22 = vpop.f32.mrb[7].mxu1  ;;  %v764_v25 = vadd.f32 %v1590_v23, %v760_v16 }
 0x247   : > { %v1598_v24 = vmul.f32 -1.442695, %v838_v18 }
 0x249   : > { %2079 = vpow2.f32 %v1598_v24 }
 0x24a   : > { %2081 = vtanh.f32 %v764_v25 }
 0x24b   : > { %v2076_v28 = vpop.eup %2075 }
 0x24c   : > { %v2078_v29 = vpop.eup %2077  ;;  %v613_v30 = vadd.f32 1.0, %v2076_v28 }
 0x24d   : > { %v690_v31 = vadd.f32 1.0, %v2078_v29  ;;  %v1612_v29 = vld [vmem:[%s2426_s6 + $0x70] sm:$0xff] }
 0x24e   : > { %2083 = vrcp.f32 %v613_v30 }
 0x24f   : > { %2085 = vrcp.f32 %v690_v31 }
 0x253   : > { %v2080_v32 = vpop.eup %2079 }
 0x254   : > { %v2082_v33 = vpop.eup %2081  ;;  %v842_v37 = vadd.f32 1.0, %v2080_v32 }
 0x256   : > { %2087 = vrcp.f32 %v842_v37 }
 0x258   : > { %v2084_v34 = vpop.eup %2083 }
 0x259   : > { %v2086_v35 = vpop.eup %2085  ;;  %v766_v36 = vmul.f32 %v2084_v34, %v2082_v33 }
 0x25a   : > { %v693_v38 = vmul.f32 %v2086_v35, %v2499_v59 }
 0x25c   : > { %v2535_v39 = vadd.f32 %v766_v36, %v693_v38 }
 0x25e   : > { %2089 = vtanh.f32 %v2535_v39 }
 0x260   : > { %v2088_v40 = vpop.eup %2087 }
 0x268   : > { %v2090_v41 = vpop.eup %2089 }
 0x269   : > { %v846_v42 = vmul.f32 %v2090_v41, %v2088_v40 }
 0x26b   : > { %1805 = vmatmul.mubr.msk.f32.vlgmr.msra.gmra.mrb[8].mxu0 %vm219_vm2, %v846_v42  ;;  %1816 = vmatmul.mubr.msk.f32.vlgmr.msra.gmra.mrb[8].mxu1 %vm219_vm2, %v846_v42 }
 0x26c   : > { %1946 = vmatpush3.bf16.msra.mxu0 %v2456_v20  ;;  %1952 = vmatpush3.bf16.msra.mxu1 %v2460_v21 }
 0x26d   : > { %1947 = vmatprep.subr.bf16.mxu0 %v2272_v4  ;;  %1953 = vmatprep.subr.bf16.mxu1 %v2272_v4 }
 0x26e   : > { %1826 = vmatprep.mubr.msk.f32.mxu0 %vm2273_vm1, %v2274_v12  ;;  %1837 = vmatprep.mubr.msk.f32.mxu1 %vm2273_vm1, %v2274_v12 }
 0x270   : > { %1949 = vmatpush3.bf16.msra.mxu0 %v2466_v26  ;;  %1955 = vmatpush3.bf16.msra.mxu1 %v2470_v27 }
 0x271   : > { %1956 = vmatprep.subr.bf16.mxu0 %v2272_v4  ;;  %1962 = vmatprep.subr.bf16.mxu1 %v2272_v4 }
 0x273   : > { %1827 = vmatmul.mubr.msk.f32.vlgmr.msra.gmra.mrb[10].mxu0 %vm219_vm2, %v846_v42  ;;  %1838 = vmatmul.mubr.msk.f32.vlgmr.msra.gmra.mrb[10].mxu1 %vm219_vm2, %v846_v42 }
 0x274   : > { %1958 = vmatpush3.bf16.msra.mxu0 %v2439_v5  ;;  %1964 = vmatpush3.bf16.msra.mxu1 %v2441_v9  ;;  %v1599_v5 = vld [vmem:[%s2426_s6 + $0x40] sm:$0xff]  ;;  %v1600_v9 = vld [vmem:[%s2426_s6 + $0x48] sm:$0xff] }
 0x275   : > { %1959 = vmatprep.subr.bf16.mxu0 %v2272_v4  ;;  %1965 = vmatprep.subr.bf16.mxu1 %v2272_v4 }
 0x276   : > { %1848 = vmatprep.mubr.msk.f32.mxu0 %vm2273_vm1, %v2274_v12  ;;  %1859 = vmatprep.mubr.msk.f32.mxu1 %vm2273_vm1, %v2274_v12 }
 0x278   : > { %1961 = vmatpush3.bf16.msra.mxu0 %v2448_v13  ;;  %1967 = vmatpush3.bf16.msra.mxu1 %v2452_v14  ;;  %v1602_v13 = vld [vmem:[%s2426_s6 + $0x58] sm:$0xff] }
 0x279   : > { %1968 = vmatprep.subr.bf16.mxu0 %v2272_v4  ;;  %1974 = vmatprep.subr.bf16.mxu1 %v2272_v4 }
 0x33e   : > { %v921_v43 = vpop.f32.mrb[8].mxu0  ;;  %v998_v44 = vpop.f32.mrb[8].mxu1 }
 0x33f   : > { %v925_v45 = vadd.f32 %v1599_v5, %v921_v43  ;;  %v1002_v46 = vadd.f32 %v1600_v9, %v998_v44  ;;  %v1806_v47 = vpop.f32.mrb[9].mxu0  ;;  %v1817_v48 = vpop.f32.mrb[9].mxu1 }
 0x341   : > { %v1604_v49 = vmul.f32 -1.442695, %v925_v45  ;;  %v1606_v50 = vmul.f32 -1.442695, %v1002_v46 }
 0x343   : > { %2091 = vpow2.f32 %v1604_v49 }
 0x344   : > { %2093 = vpow2.f32 %v1606_v50 }
 0x346   : > { %v1076_v51 = vpop.f32.mrb[10].mxu0  ;;  %v1150_v14 = vpop.f32.mrb[10].mxu1 }
 0x347   : > { %v1154_v52 = vadd.f32 %v1602_v13, %v1150_v14  ;;  %v1828_v53 = vpop.f32.mrb[11].mxu0  ;;  %v1839_v54 = vpop.f32.mrb[11].mxu1  ;;  %v1080_v57 = vadd.f32 %v1601_v55, %v1076_v51 }
 0x349   : > { %v1609_v56 = vmul.f32 -1.442695, %v1154_v52 }
 0x34b   : > { %2095 = vpow2.f32 %v1609_v56 }
 0x34c   : > { %2097 = vtanh.f32 %v1080_v57 }
 0x34d   : > { %v2092_v58 = vpop.eup %2091 }
 0x34e   : > { %v2094_v59 = vpop.eup %2093  ;;  %v929_v60 = vadd.f32 1.0, %v2092_v58 }
 0x34f   : > { %v1006_v61 = vadd.f32 1.0, %v2094_v59 }
 0x350   : > { %2099 = vrcp.f32 %v929_v60 }
 0x351   : > { %2101 = vrcp.f32 %v1006_v61 }
 0x355   : > { %v2096_v62 = vpop.eup %2095 }
 0x356   : > { %v2098_v63 = vpop.eup %2097  ;;  %v1158_v3 = vadd.f32 1.0, %v2096_v62 }
 0x358   : > { %2103 = vrcp.f32 %v1158_v3 }
 0x35a   : > { %v2100_v0 = vpop.eup %2099 }
 0x35b   : > { %v2102_v1 = vpop.eup %2101  ;;  %v1082_v2 = vmul.f32 %v2100_v0, %v2098_v63 }
 0x35c   : > { %v1009_v6 = vmul.f32 %v2102_v1, %v2535_v39 }
 0x35e   : > { %v1083_v7 = vadd.f32 %v1082_v2, %v1009_v6 }
 0x360   : > { %2105 = vtanh.f32 %v1083_v7 }
 0x362   : > { %v2104_v8 = vpop.eup %2103 }
 0x36a   : > { %v2106_v10 = vpop.eup %2105 }
 0x36b   : > { %v1162_v11 = vmul.f32 %v2106_v10, %v2104_v8 }
 0x36d   : > { %1849 = vmatmul.mubr.msk.f32.vlgmr.msra.gmra.mrb[12].mxu0 %vm219_vm2, %v1162_v11  ;;  %1860 = vmatmul.mubr.msk.f32.vlgmr.msra.gmra.mrb[12].mxu1 %vm219_vm2, %v1162_v11 }
 0x36e   : > { %1970 = vmatpush3.bf16.msra.mxu0 %v2456_v20  ;;  %1976 = vmatpush3.bf16.msra.mxu1 %v2460_v21  ;;  %v1610_v20 = vld [vmem:[%s2426_s6 + $0x60] sm:$0xff]  ;;  %v1611_v21 = vld [vmem:[%s2426_s6 + $0x68] sm:$0xff] }
 0x36f   : > { %1971 = vmatprep.subr.bf16.mxu0 %v2272_v4  ;;  %1977 = vmatprep.subr.bf16.mxu1 %v2272_v4 }
 0x370   : > { %1870 = vmatprep.mubr.msk.f32.mxu0 %vm2273_vm1, %v2274_v12  ;;  %1881 = vmatprep.mubr.msk.f32.mxu1 %vm2273_vm1, %v2274_v12 }
 0x372   : > { %1973 = vmatpush3.bf16.msra.mxu0 %v2466_v26  ;;  %1979 = vmatpush3.bf16.msra.mxu1 %v2470_v27  ;;  %v1613_v26 = vld [vmem:[%s2426_s6 + $0x78] sm:$0xff] }
 0x375   : > { %1871 = vmatmul.mubr.msk.f32.vlgmr.msra.gmra.mrb[14].mxu0 %vm219_vm2, %v1162_v11  ;;  %1882 = vmatmul.mubr.msk.f32.vlgmr.msra.gmra.mrb[14].mxu1 %vm219_vm2, %v1162_v11 }
 0x440   : > { %v1237_v15 = vpop.f32.mrb[12].mxu0  ;;  %v1314_v4 = vpop.f32.mrb[12].mxu1 }
 0x441   : > { %v1241_v16 = vadd.f32 %v1610_v20, %v1237_v15  ;;  %v1318_v17 = vadd.f32 %v1611_v21, %v1314_v4  ;;  %v1850_v18 = vpop.f32.mrb[13].mxu0  ;;  %v1861_v19 = vpop.f32.mrb[13].mxu1 }
 0x443   : > { %v1615_v22 = vmul.f32 -1.442695, %v1241_v16  ;;  %v1617_v12 = vmul.f32 -1.442695, %v1318_v17 }
 0x445   : > { %2107 = vpow2.f32 %v1615_v22 }
 0x446   : > { %2109 = vpow2.f32 %v1617_v12 }
 0x448   : > { %v1392_v23 = vpop.f32.mrb[14].mxu0  ;;  %v1466_v27 = vpop.f32.mrb[14].mxu1 }
 0x449   : > { %v1470_v24 = vadd.f32 %v1613_v26, %v1466_v27  ;;  %v1872_v25 = vpop.f32.mrb[15].mxu0  ;;  %v1883_v28 = vpop.f32.mrb[15].mxu1  ;;  %v1396_v31 = vadd.f32 %v1612_v29, %v1392_v23 }
 0x44b   : > { %v1620_v30 = vmul.f32 -1.442695, %v1470_v24 }
 0x44d   : > { %2111 = vpow2.f32 %v1620_v30 }
 0x44e   : > { %2113 = vtanh.f32 %v1396_v31 }
 0x44f   : > { %v2108_v32 = vpop.eup %2107 }
 0x450   : > { %v2110_v33 = vpop.eup %2109  ;;  %v1245_v34 = vadd.f32 1.0, %v2108_v32 }
 0x451   : > { %v1322_v35 = vadd.f32 1.0, %v2110_v33 }
 0x452   : > { %2115 = vrcp.f32 %v1245_v34 }
 0x453   : > { %2117 = vrcp.f32 %v1322_v35 }
 0x457   : > { %v2112_v36 = vpop.eup %2111 }
 0x458   : > { %v2114_v37 = vpop.eup %2113  ;;  %v1474_v41 = vadd.f32 1.0, %v2112_v36 }
 0x45a   : > { %2119 = vrcp.f32 %v1474_v41 }
 0x45c   : > { %v2116_v38 = vpop.eup %2115 }
 0x45d   : > { %v2118_v39 = vpop.eup %2117  ;;  %v1398_v40 = vmul.f32 %v2116_v38, %v2114_v37 }
 0x45e   : > { %v1325_v42 = vmul.f32 %v2118_v39, %v1083_v7 }
 0x460   : > { %v1399_v5 = vadd.f32 %v1398_v40, %v1325_v42 }
 0x462   : > { %2121 = vtanh.f32 %v1399_v5  ;;  %1480 = vst.msk [vmem:[#allocation3] sm:$0xff] %vm219_vm2, %v1399_v5 }
 0x464   : > { %v2120_v9 = vpop.eup %2119 }
 0x469   : > { %1484 = sbr.rel (%p1621_p1) target bundleno = 1144 (0x478), region = 44 }
 0x46c   : > { %v2122_v43 = vpop.eup %2121 }
 0x46d   : > { %v1478_v44 = vmul.f32 %v2122_v43, %v2120_v9 }
 0x46f   : > { %1479 = vst.msk [vmem:[#allocation2] sm:$0xff] %vm219_vm2, %v1478_v44 }
 0x476   : > { %v1485_v45 = vld [vmem:[#allocation2] sm:$0xff] }
 0x477   : > { %1486 = vst.msk [vmem:[#allocation9] sm:$0xff] %vm219_vm2, %v1485_v45 }
 0x478 PF: > { %p2595_p4 = scmp.eq.s32.totalorder %s1569_s15, 1  ;;  %s2275_s17 = smov [#allocation9]  }
 0x479   : > { %s1496_s18 = sshll.u32 %s2275_s17, 4  ;;  %s1497_s18 = int_to_ptr.vmem [resolvable:$true] %s1496_s18 }
 0x47a   : > { %s2181_s3 = scalar_lea.vmem %s1497_s18, 128  ;;  %p2188_p10 = scmp.lt.s32.totalorder %s1497_s18, %s1497_s18 }
 0x47b   : > { %p2182_p5 = scmp.ne.s32.totalorder %s1497_s18, %s2181_s3  ;;  %p2189_p11 = scmp.lt.s32.totalorder %s2181_s3, %s2181_s3 }
 0x47d   : > { %p2183_p8 = pnand %p2182_p5, %p2595_p4  ;;  %p2190_p13 = por %p2189_p11, %p2188_p10 }
 0x47f   : > { %p2184_p9 = pneg %p2183_p8 }
 0x481   : > { %p2191_p2 = pnand %p2190_p13, %p2184_p9 }
 0x483   : > { %2194 = shalt.err (!%p2191_p2)
}
 0x484   : > { %s2195_s15 = scalar_lea.hbm %s2641_s2, 128 }
 0x485   : > { %p2196_p3 = scmp.ne.s32.totalorder %s2641_s2, %s2195_s15  ;;  %p2201_p6 = scmp.lt.u32.totalorder %s2195_s15, %s2641_s2 }
 0x487   : > { %p2197_p12 = pnand %p2196_p3, %p2595_p4 }
 0x489   : > { %p2198_p0 = pneg %p2197_p12 }
 0x48b   : > { %p2203_p7 = pnand %p2201_p6, %p2198_p0 }
 0x48d   : > { %2206 = shalt.err (!%p2203_p7)
}
 0x48e   : > { %1987 = dma.vmem_to_hbm [thread:$0]  (%p2595_p4), %s1497_s18, 128, %s2641_s2, [#allocation6]  }
 0x48f   : > { %2240 = dma.done.wait (%p2595_p4), [#allocation6], 128  }
 0x490   : > { %2242 = vsyncadd (%p2595_p4), [#allocation6], 4294967168 }
 0x491 PF: > { %s17_s14 = sadd.s32 1, %s2265_s14   ;;  %s2655_s9 = smov %s2249_s10 }
 0x492   : > { %p14_p1 = scmp.ge.s32.totalorder %s17_s14, 4   ;;  %s2656_s10 = smov %s2253_s11 }
 0x493   : > { %s2657_s11 = smov %s2379_s23  ;;  %s2658_s12 = smov %s2261_s13 }
 0x494   : > { %s2659_s13 = smov %s2661_s22  ;;  %16 = sbr.rel (!%p14_p1) target bundleno = 6 (0x6), region = 84 }
 0x49b   :  { %1509 = vsyncpa [#allocation5], 1 }
 0x49c   :  { %1511 = vsyncpa [#allocation5 + $0x1], 1 }
 0x49d   :  { %1512 = vsyncpa [#allocation8], 1 }
 0x49e   :  { %1513 = vsyncpa [#allocation6], 1 }
 0x49f   :  { %1515 = vsyncpa [#allocation6 + $0x1], 1 }

</bundles_post_ra>
